<compile_context>
chip_gen: v7x
topology: tpu7x:2x2x1
jax: 0.10.0
libtpu: 0.0.40
codegen_flags: <defaults>
</compile_context>

<pallas_src>
import jax
import jax.numpy as jnp
from jax.experimental import pallas as pl
from jax.experimental.pallas import tpu as pltpu

NFEAT = 32
NHEADS = 128


def _elu(x):
    # ELU(alpha=1): x if x > 0 else exp(x) - 1 (select discards exp overflow on + lanes)
    return jnp.where(x > 0, x, jnp.exp(x) - 1.0)


def deepsets_kernel(
    x1_ref, x2_ref,
    ew1, eb1, ew2, eb2, ew3, eb3,
    wf, fb, dw1b, db1,
    dw2, db2, dw3, db3, dw4, db4, dw5, db5, dw6, db6,
    out_ref,
):
    f32 = jnp.float32
    bf16 = jnp.bfloat16

    x1 = x1_ref[...]                                    # (TB, 8) = 4 slots x 2 features
    x2 = x2_ref[...]                                    # (TB, 1)
    tb = x1.shape[0]

    # ------------------------------ encoder MLP ------------------------------
    # Layer 1 has K=2: per-slot VPU broadcast-FMAs (f32), each slab full 128-lane dense.
    ew1_0 = ew1[0:1, :]
    ew1_1 = ew1[1:2, :]
    eb1v = eb1[...]
    hs = [
        _elu(x1[:, 2 * k:2 * k + 1] * ew1_0 + x1[:, 2 * k + 1:2 * k + 2] * ew1_1 + eb1v)
        for k in range(4)
    ]
    h = jnp.concatenate(hs, axis=0)                     # (4*TB, 128), slot-major sublanes

    h = _elu(jnp.dot(h.astype(bf16), ew2[...], preferred_element_type=f32) + eb2[...])
    h = _elu(jnp.dot(h.astype(bf16), ew3[...], preferred_element_type=f32) + eb3[...])

    # -------- deep-sets pooling on the 128-wide hidden (fused through ew4@dw1a) ------
    h0 = h[0 * tb:1 * tb]
    h1 = h[1 * tb:2 * tb]
    h2 = h[2 * tb:3 * tb]
    h3 = h[3 * tb:4 * tb]
    v = [(x1[:, 2 * k:2 * k + 1] != -1.0).astype(f32) for k in range(4)]  # padded rows == -1
    count = v[0] + v[1] + v[2] + v[3]                   # (TB, 1), exact small ints in f32
    w4 = jnp.where(count == 4.0, 0.25, 0.0)             # quads: mean of all 4 rows
    w2 = jnp.where(count == 2.0, 0.5, 0.0)              # doubles: mean of slots 0,1
    pooled_h = w4 * (h0 + h1 + h2 + h3) + w2 * (h0 + h1)  # (TB, 128); else -> zeros
    sumw = w4 * 4.0 + w2 * 2.0                          # 1.0 on valid pooling, else 0.0

    # ---------- decoder MLP (enc layer 4 + concat([pooled, x2]) folded into layer 1) ----------
    d = _elu(jnp.dot(pooled_h.astype(bf16), wf[...], preferred_element_type=f32)
             + sumw * fb[...]                           # fused eb4 @ dw1a bias
             + x2 * dw1b[...]                           # x2 concat column (f32)
             + db1[...])
    d = _elu(jnp.dot(d.astype(bf16), dw2[...], preferred_element_type=f32) + db2[...])
    d = _elu(jnp.dot(d.astype(bf16), dw3[...], preferred_element_type=f32) + db3[...])
    d = _elu(jnp.dot(d.astype(bf16), dw4[...], preferred_element_type=f32) + db4[...])
    d = _elu(jnp.dot(d.astype(bf16), dw5[...], preferred_element_type=f32) + db5[...])
    out_ref[...] = jnp.dot(d.astype(bf16), dw6[...], preferred_element_type=f32) + db6[...]


def deepsets_forward(x1, x2, enc_params, dec_params, block_b=None):
    """x1: (B, 4, 2) f32, x2: (B, 1) f32 -> (B, 2) f32.

    block_b is the batch tile (multiple of 8).  Default keeps >= 2 grid steps
    (balanced megacore sharding on v7x) and caps at 1024; larger tiles (up to ~2048
    on v6e / v7x) raise the VMEM limit automatically.  The kernel is compute-bound
    (~19 kFLOP/byte) so bigger tiles only amortize the ~0.35 us/step overhead.
    """
    b = x1.shape[0]
    if block_b is None:
        block_b = min(b, 1024)
        if block_b == b and b >= 16 and (b // 2) % 8 == 0:
            block_b = b // 2                            # keep grid >= 2 for megacore
    assert b % block_b == 0, "batch must be a multiple of block_b"
    assert block_b == b or block_b % 8 == 0, "block_b must be sublane-aligned"

    # glue: pack slots into the lane dim -> one dense (B, 8) plane, no lane padding per slot
    x1p = x1.reshape(b, 8)

    (ew1, eb1), (ew2, eb2), (ew3, eb3), (ew4, eb4) = enc_params
    (dw1, db1), (dw2, db2), (dw3, db3), (dw4, db4), (dw5, db5), (dw6, db6) = dec_params

    bf = lambda w: w.astype(jnp.bfloat16)
    # Fuse enc layer 4 and the pooled-feature part of dec layer 1 through the linear pooling:
    #   pooled_enc @ dw1a == pooled_h @ (ew4 @ dw1a) + sumw * (eb4 @ dw1a)
    dw1a = dw1[:NFEAT, :]                               # (NFEAT, 2H)  acts on pooled features
    wf = bf(ew4 @ dw1a)                                 # (NHEADS, 2H) fused weight, f32 product -> bf16 once
    fb = eb4 @ dw1a                                     # (1, 2H)      fused bias, f32
    dw1b = dw1[NFEAT:NFEAT + 1, :]                      # (1, 2H)      x2 column, stays f32

    # MXU weights in bf16 (f32 accumulation in-kernel); layer 1, biases, x2 path stay f32.
    weights = [
        ew1, eb1, bf(ew2), eb2, bf(ew3), eb3,
        wf, fb, dw1b, db1,
        bf(dw2), db2, bf(dw3), db3, bf(dw4), db4, bf(dw5), db5, bf(dw6), db6,
    ]

    def resident(a):
        zeros = (0,) * a.ndim
        return pl.BlockSpec(a.shape, lambda i, z=zeros: z)   # constant index map -> stays in VMEM

    grid = (b // block_b,)
    in_specs = [
        pl.BlockSpec((block_b, 8), lambda i: (i, 0)),         # x1 packed (slot*feature in lanes)
        pl.BlockSpec((block_b, 1), lambda i: (i, 0)),         # x2
    ] + [resident(w) for w in weights]
    out_specs = pl.BlockSpec((block_b, 2), lambda i: (i, 0))

    # 32 MiB covers tiles up to 1024 on every gen; larger tiles need more scoped VMEM
    # (56 MiB keeps headroom under v7x's 64 MiB physical VMEM).
    vmem_limit = 32 * 1024 * 1024 if block_b <= 1024 else 56 * 1024 * 1024

    return pl.pallas_call(
        deepsets_kernel,
        out_shape=jax.ShapeDtypeStruct((b, 2), jnp.float32),
        grid=grid,
        in_specs=in_specs,
        out_specs=out_specs,
        compiler_params=pltpu.CompilerParams(
            dimension_semantics=("parallel",),                # megacore sharding on v7x
            vmem_limit_bytes=vmem_limit,
        ),
    )(x1p, x2, *weights)


# ------------------------- parameter construction ---------------------------
def _init_linear(key, fan_in, fan_out):
    # deterministic, PyTorch-Linear-style U(-1/sqrt(fan_in), 1/sqrt(fan_in))
    kw, kb = jax.random.split(key)
    bound = 1.0 / (fan_in ** 0.5)
    w = jax.random.uniform(kw, (fan_in, fan_out), jnp.float32, -bound, bound)
    bias = jax.random.uniform(kb, (1, fan_out), jnp.float32, -bound, bound)
    return w, bias


def build_params(key):
    keys = jax.random.split(key, 10)
    enc = [
        _init_linear(keys[0], 2, NHEADS),
        _init_linear(keys[1], NHEADS, NHEADS),
        _init_linear(keys[2], NHEADS, NHEADS),
        _init_linear(keys[3], NHEADS, NFEAT),
    ]
    dec = [
        _init_linear(keys[4], NFEAT + 1, 2 * NHEADS),
        _init_linear(keys[5], 2 * NHEADS, 2 * NHEADS),
        _init_linear(keys[6], 2 * NHEADS, 2 * NHEADS),
        _init_linear(keys[7], 2 * NHEADS, 2 * NHEADS),
        _init_linear(keys[8], 2 * NHEADS, 2 * NHEADS),
        _init_linear(keys[9], 2 * NHEADS, 2),
    ]
    return enc, dec


# ------------------------ pure-JAX references (checks) ----------------------
def reference_forward(x1, x2, enc_params, dec_params):
    """Full-f32 reference matching the PyTorch module semantics."""
    b = x1.shape[0]
    h = x1.reshape(b * 4, 2)
    for i, (w, bias) in enumerate(enc_params):
        h = h @ w + bias
        if i < len(enc_params) - 1:
            h = _elu(h)
    enc = h.reshape(b, 4, NFEAT)
    count = jnp.sum(x1[:, :, 0] != -1.0, axis=1)
    idx = jnp.arange(4)[None, :]
    w = jnp.where(
        count[:, None] == 4, 0.25,
        jnp.where((count[:, None] == 2) & (idx < 2), 0.5, 0.0),
    )
    pooled = jnp.sum(enc * w[:, :, None], axis=1)
    d = jnp.concatenate([pooled, x2], axis=1)
    for i, (wd, bd) in enumerate(dec_params):
        d = d @ wd + bd
        if i < len(dec_params) - 1:
            d = _elu(d)
    return d


def reference_forward_fused(x1, x2, enc_params, dec_params):
    """Mirrors the kernel's dtype + fusion strategy (bf16 matmul operands, f32 accum,
    f32 layer-1/biases/elementwise, fused ew4@dw1a) for a tight numerical check."""
    bf16, f32 = jnp.bfloat16, jnp.float32
    b = x1.shape[0]
    (ew1, eb1), (ew2, eb2), (ew3, eb3), (ew4, eb4) = enc_params
    (dw1, db1), (dw2, db2), (dw3, db3), (dw4, db4), (dw5, db5), (dw6, db6) = dec_params

    dw1a = dw1[:NFEAT, :]
    wf = (ew4 @ dw1a).astype(bf16)                       # f32 product, single cast
    fb = eb4 @ dw1a
    dw1b = dw1[NFEAT:NFEAT + 1, :]

    def mm(a, w):
        return jnp.dot(a.astype(bf16), w.astype(bf16), preferred_element_type=f32)

    xall = jnp.transpose(x1, (1, 0, 2)).reshape(4 * b, 2)          # slot-major rows
    h = _elu(xall[:, 0:1] * ew1[0:1, :] + xall[:, 1:2] * ew1[1:2, :] + eb1)  # f32 layer 1
    h = _elu(mm(h, ew2) + eb2)
    h = _elu(mm(h, ew3) + eb3)
    h = h.reshape(4, b, NHEADS)

    count = jnp.sum(x1[:, :, 0] != -1.0, axis=1, keepdims=True).astype(f32)
    w4 = jnp.where(count == 4.0, 0.25, 0.0)
    w2 = jnp.where(count == 2.0, 0.5, 0.0)
    pooled_h = w4 * (h[0] + h[1] + h[2] + h[3]) + w2 * (h[0] + h[1])
    sumw = w4 * 4.0 + w2 * 2.0

    d = _elu(mm(pooled_h, wf) + sumw * fb + x2 * dw1b + db1)
    d = _elu(mm(d, dw2) + db2)
    d = _elu(mm(d, dw3) + db3)
    d = _elu(mm(d, dw4) + db4)
    d = _elu(mm(d, dw5) + db5)
    return mm(d, dw6) + db6


if __name__ == "__main__":
    key = jax.random.PRNGKey(0)
    k_param, k_x1, k_x2 = jax.random.split(key, 3)

    # Small demo batch (realistic runs use B >> 1k; the default block_b logic handles it).
    B = 16
    # valid image positions strictly > 0 so the padding value -1 is unambiguous
    x1 = jax.random.uniform(k_x1, (B, 4, 2), jnp.float32, minval=0.1, maxval=2.0)
    # samples 3..5 and 10..12 are doubles (slots 2,3 padded); sample 6 has count==3 -> zeros path
    x1 = x1.at[3:6, 2:, :].set(-1.0)
    x1 = x1.at[6, 3, :].set(-1.0)
    x1 = x1.at[10:13, 2:, :].set(-1.0)
    x2 = jax.random.normal(k_x2, (B, 1), jnp.float32)

    enc_params, dec_params = build_params(k_param)

    # block_b=8 -> 2 grid steps, exercising the batch pipeline and megacore path.
    out = jax.block_until_ready(deepsets_forward(x1, x2, enc_params, dec_params, block_b=8))

    ref_fused = jax.block_until_ready(reference_forward_fused(x1, x2, enc_params, dec_params))
    ref_f32 = jax.block_until_ready(reference_forward(x1, x2, enc_params, dec_params))

    assert out.shape == (B, 2)
    # tight check vs. the dtype/fusion-matched reference (verifies the Pallas lowering)
    assert jnp.allclose(out, ref_fused, rtol=1e-2, atol=1e-2), (out, ref_fused)
    # semantic check vs. the full-f32 PyTorch-equivalent reference (bf16 matmul tolerance)
    assert jnp.allclose(out, ref_f32, rtol=5e-2, atol=5e-2), (out, ref_f32)

    print("KERNEL_OK")
</pallas_src>

<mosaic_0001>
module attributes {stable_mosaic.version = 11 : i64} {
  func.func @deepsets_kernel(%arg0: i32, %arg1: memref<8x8xf32, #tpu.memory_space<vmem>>, %arg2: memref<8x1xf32, #tpu.memory_space<vmem>>, %arg3: memref<2x128xf32, #tpu.memory_space<vmem>>, %arg4: memref<1x128xf32, #tpu.memory_space<vmem>>, %arg5: memref<128x128xbf16, #tpu.memory_space<vmem>>, %arg6: memref<1x128xf32, #tpu.memory_space<vmem>>, %arg7: memref<128x128xbf16, #tpu.memory_space<vmem>>, %arg8: memref<1x128xf32, #tpu.memory_space<vmem>>, %arg9: memref<128x256xbf16, #tpu.memory_space<vmem>>, %arg10: memref<1x256xf32, #tpu.memory_space<vmem>>, %arg11: memref<1x256xf32, #tpu.memory_space<vmem>>, %arg12: memref<1x256xf32, #tpu.memory_space<vmem>>, %arg13: memref<256x256xbf16, #tpu.memory_space<vmem>>, %arg14: memref<1x256xf32, #tpu.memory_space<vmem>>, %arg15: memref<256x256xbf16, #tpu.memory_space<vmem>>, %arg16: memref<1x256xf32, #tpu.memory_space<vmem>>, %arg17: memref<256x256xbf16, #tpu.memory_space<vmem>>, %arg18: memref<1x256xf32, #tpu.memory_space<vmem>>, %arg19: memref<256x256xbf16, #tpu.memory_space<vmem>>, %arg20: memref<1x256xf32, #tpu.memory_space<vmem>>, %arg21: memref<256x2xbf16, #tpu.memory_space<vmem>>, %arg22: memref<1x2xf32, #tpu.memory_space<vmem>>, %arg23: memref<8x2xf32, #tpu.memory_space<vmem>>) attributes {dimension_semantics = [#tpu.dimension_semantics<parallel>], iteration_bounds = array<i64: 2>, scalar_prefetch = 0 : i64, scratch_operands = 0 : i64, tpu.core_type = #tpu.core_type<tc>, window_params = [{transform_indices = @transform_0, window_bounds = array<i64: 8, 8>}, {transform_indices = @transform_1, window_bounds = array<i64: 8, 1>}, {pipeline_mode = #tpu.pipeline_mode<synchronous>, transform_indices = @transform_2, window_bounds = array<i64: 2, 128>}, {pipeline_mode = #tpu.pipeline_mode<synchronous>, transform_indices = @transform_3, window_bounds = array<i64: 1, 128>}, {pipeline_mode = #tpu.pipeline_mode<synchronous>, transform_indices = @transform_4, window_bounds = array<i64: 128, 128>}, {pipeline_mode = #tpu.pipeline_mode<synchronous>, transform_indices = @transform_5, window_bounds = array<i64: 1, 128>}, {pipeline_mode = #tpu.pipeline_mode<synchronous>, transform_indices = @transform_6, window_bounds = array<i64: 128, 128>}, {pipeline_mode = #tpu.pipeline_mode<synchronous>, transform_indices = @transform_7, window_bounds = array<i64: 1, 128>}, {pipeline_mode = #tpu.pipeline_mode<synchronous>, transform_indices = @transform_8, window_bounds = array<i64: 128, 256>}, {pipeline_mode = #tpu.pipeline_mode<synchronous>, transform_indices = @transform_9, window_bounds = array<i64: 1, 256>}, {pipeline_mode = #tpu.pipeline_mode<synchronous>, transform_indices = @transform_10, window_bounds = array<i64: 1, 256>}, {pipeline_mode = #tpu.pipeline_mode<synchronous>, transform_indices = @transform_11, window_bounds = array<i64: 1, 256>}, {pipeline_mode = #tpu.pipeline_mode<synchronous>, transform_indices = @transform_12, window_bounds = array<i64: 256, 256>}, {pipeline_mode = #tpu.pipeline_mode<synchronous>, transform_indices = @transform_13, window_bounds = array<i64: 1, 256>}, {pipeline_mode = #tpu.pipeline_mode<synchronous>, transform_indices = @transform_14, window_bounds = array<i64: 256, 256>}, {pipeline_mode = #tpu.pipeline_mode<synchronous>, transform_indices = @transform_15, window_bounds = array<i64: 1, 256>}, {pipeline_mode = #tpu.pipeline_mode<synchronous>, transform_indices = @transform_16, window_bounds = array<i64: 256, 256>}, {pipeline_mode = #tpu.pipeline_mode<synchronous>, transform_indices = @transform_17, window_bounds = array<i64: 1, 256>}, {pipeline_mode = #tpu.pipeline_mode<synchronous>, transform_indices = @transform_18, window_bounds = array<i64: 256, 256>}, {pipeline_mode = #tpu.pipeline_mode<synchronous>, transform_indices = @transform_19, window_bounds = array<i64: 1, 256>}, {pipeline_mode = #tpu.pipeline_mode<synchronous>, transform_indices = @transform_20, window_bounds = array<i64: 256, 2>}, {pipeline_mode = #tpu.pipeline_mode<synchronous>, transform_indices = @transform_21, window_bounds = array<i64: 1, 2>}, {transform_indices = @transform_22, window_bounds = array<i64: 8, 2>}]} {
    %c0 = arith.constant 0 : index
    %c0_0 = arith.constant 0 : index
    %0 = vector.load %arg1[%c0, %c0_0] : memref<8x8xf32, #tpu.memory_space<vmem>>, vector<8x8xf32>
    %c0_1 = arith.constant 0 : index
    %c0_2 = arith.constant 0 : index
    %1 = vector.load %arg2[%c0_1, %c0_2] : memref<8x1xf32, #tpu.memory_space<vmem>>, vector<8x1xf32>
    %c0_3 = arith.constant 0 : index
    %c0_4 = arith.constant 0 : index
    %2 = vector.load %arg3[%c0_3, %c0_4] : memref<2x128xf32, #tpu.memory_space<vmem>>, vector<1x128xf32>
    %c1 = arith.constant 1 : index
    %c0_5 = arith.constant 0 : index
    %3 = vector.load %arg3[%c1, %c0_5] : memref<2x128xf32, #tpu.memory_space<vmem>>, vector<1x128xf32>
    %c0_6 = arith.constant 0 : index
    %c0_7 = arith.constant 0 : index
    %4 = vector.load %arg4[%c0_6, %c0_7] : memref<1x128xf32, #tpu.memory_space<vmem>>, vector<1x128xf32>
    %5 = vector.extract_strided_slice %0 {offsets = [0, 0], sizes = [8, 1], strides = [1, 1]} : vector<8x8xf32> to vector<8x1xf32>
    %6 = vector.broadcast %5 : vector<8x1xf32> to vector<8x128xf32>
    %7 = vector.broadcast %2 : vector<1x128xf32> to vector<8x128xf32>
    %8 = arith.mulf %6, %7 : vector<8x128xf32>
    %9 = vector.extract_strided_slice %0 {offsets = [0, 1], sizes = [8, 1], strides = [1, 1]} : vector<8x8xf32> to vector<8x1xf32>
    %10 = vector.broadcast %9 : vector<8x1xf32> to vector<8x128xf32>
    %11 = vector.broadcast %3 : vector<1x128xf32> to vector<8x128xf32>
    %12 = arith.mulf %10, %11 : vector<8x128xf32>
    %13 = arith.addf %8, %12 : vector<8x128xf32>
    %14 = vector.broadcast %4 : vector<1x128xf32> to vector<8x128xf32>
    %15 = arith.addf %13, %14 : vector<8x128xf32>
    %cst = arith.constant 0.000000e+00 : f32
    %16 = vector.broadcast %cst : f32 to vector<8x128xf32>
    %17 = arith.cmpf ogt, %15, %16 : vector<8x128xf32>
    %18 = math.exp %15 : vector<8x128xf32>
    %cst_8 = arith.constant 1.000000e+00 : f32
    %19 = vector.broadcast %cst_8 : f32 to vector<8x128xf32>
    %20 = arith.subf %18, %19 : vector<8x128xf32>
    %21 = arith.select %17, %15, %20 : vector<8x128xi1>, vector<8x128xf32>
    %22 = vector.extract_strided_slice %0 {offsets = [0, 2], sizes = [8, 1], strides = [1, 1]} : vector<8x8xf32> to vector<8x1xf32>
    %23 = vector.broadcast %22 : vector<8x1xf32> to vector<8x128xf32>
    %24 = vector.broadcast %2 : vector<1x128xf32> to vector<8x128xf32>
    %25 = arith.mulf %23, %24 : vector<8x128xf32>
    %26 = vector.extract_strided_slice %0 {offsets = [0, 3], sizes = [8, 1], strides = [1, 1]} : vector<8x8xf32> to vector<8x1xf32>
    %27 = vector.broadcast %26 : vector<8x1xf32> to vector<8x128xf32>
    %28 = vector.broadcast %3 : vector<1x128xf32> to vector<8x128xf32>
    %29 = arith.mulf %27, %28 : vector<8x128xf32>
    %30 = arith.addf %25, %29 : vector<8x128xf32>
    %31 = vector.broadcast %4 : vector<1x128xf32> to vector<8x128xf32>
    %32 = arith.addf %30, %31 : vector<8x128xf32>
    %cst_9 = arith.constant 0.000000e+00 : f32
    %33 = vector.broadcast %cst_9 : f32 to vector<8x128xf32>
    %34 = arith.cmpf ogt, %32, %33 : vector<8x128xf32>
    %35 = math.exp %32 : vector<8x128xf32>
    %cst_10 = arith.constant 1.000000e+00 : f32
    %36 = vector.broadcast %cst_10 : f32 to vector<8x128xf32>
    %37 = arith.subf %35, %36 : vector<8x128xf32>
    %38 = arith.select %34, %32, %37 : vector<8x128xi1>, vector<8x128xf32>
    %39 = vector.extract_strided_slice %0 {offsets = [0, 4], sizes = [8, 1], strides = [1, 1]} : vector<8x8xf32> to vector<8x1xf32>
    %40 = vector.broadcast %39 : vector<8x1xf32> to vector<8x128xf32>
    %41 = vector.broadcast %2 : vector<1x128xf32> to vector<8x128xf32>
    %42 = arith.mulf %40, %41 : vector<8x128xf32>
    %43 = vector.extract_strided_slice %0 {offsets = [0, 5], sizes = [8, 1], strides = [1, 1]} : vector<8x8xf32> to vector<8x1xf32>
    %44 = vector.broadcast %43 : vector<8x1xf32> to vector<8x128xf32>
    %45 = vector.broadcast %3 : vector<1x128xf32> to vector<8x128xf32>
    %46 = arith.mulf %44, %45 : vector<8x128xf32>
    %47 = arith.addf %42, %46 : vector<8x128xf32>
    %48 = vector.broadcast %4 : vector<1x128xf32> to vector<8x128xf32>
    %49 = arith.addf %47, %48 : vector<8x128xf32>
    %cst_11 = arith.constant 0.000000e+00 : f32
    %50 = vector.broadcast %cst_11 : f32 to vector<8x128xf32>
    %51 = arith.cmpf ogt, %49, %50 : vector<8x128xf32>
    %52 = math.exp %49 : vector<8x128xf32>
    %cst_12 = arith.constant 1.000000e+00 : f32
    %53 = vector.broadcast %cst_12 : f32 to vector<8x128xf32>
    %54 = arith.subf %52, %53 : vector<8x128xf32>
    %55 = arith.select %51, %49, %54 : vector<8x128xi1>, vector<8x128xf32>
    %56 = vector.extract_strided_slice %0 {offsets = [0, 6], sizes = [8, 1], strides = [1, 1]} : vector<8x8xf32> to vector<8x1xf32>
    %57 = vector.broadcast %56 : vector<8x1xf32> to vector<8x128xf32>
    %58 = vector.broadcast %2 : vector<1x128xf32> to vector<8x128xf32>
    %59 = arith.mulf %57, %58 : vector<8x128xf32>
    %60 = vector.extract_strided_slice %0 {offsets = [0, 7], sizes = [8, 1], strides = [1, 1]} : vector<8x8xf32> to vector<8x1xf32>
    %61 = vector.broadcast %60 : vector<8x1xf32> to vector<8x128xf32>
    %62 = vector.broadcast %3 : vector<1x128xf32> to vector<8x128xf32>
    %63 = arith.mulf %61, %62 : vector<8x128xf32>
    %64 = arith.addf %59, %63 : vector<8x128xf32>
    %65 = vector.broadcast %4 : vector<1x128xf32> to vector<8x128xf32>
    %66 = arith.addf %64, %65 : vector<8x128xf32>
    %cst_13 = arith.constant 0.000000e+00 : f32
    %67 = vector.broadcast %cst_13 : f32 to vector<8x128xf32>
    %68 = arith.cmpf ogt, %66, %67 : vector<8x128xf32>
    %69 = math.exp %66 : vector<8x128xf32>
    %cst_14 = arith.constant 1.000000e+00 : f32
    %70 = vector.broadcast %cst_14 : f32 to vector<8x128xf32>
    %71 = arith.subf %69, %70 : vector<8x128xf32>
    %72 = arith.select %68, %66, %71 : vector<8x128xi1>, vector<8x128xf32>
    %73 = tpu.concatenate %21, %38, %55, %72 in 0 : vector<8x128xf32>, vector<8x128xf32>, vector<8x128xf32>, vector<8x128xf32> -> vector<32x128xf32>
    %74 = arith.truncf %73 : vector<32x128xf32> to vector<32x128xbf16>
    %c0_15 = arith.constant 0 : index
    %c0_16 = arith.constant 0 : index
    %75 = vector.load %arg5[%c0_15, %c0_16] : memref<128x128xbf16, #tpu.memory_space<vmem>>, vector<128x128xbf16>
    %cst_17 = arith.constant dense<0.000000e+00> : vector<32x128xf32>
    %76 = tpu.matmul %74, %75, %cst_17 {dimension_numbers = #tpu.dot_dimension_numbers<[1], [0], [0], [1], [0, 0, 1, 1], [], []>} : vector<32x128xbf16>, vector<128x128xbf16>, vector<32x128xf32> -> vector<32x128xf32>
    %c0_18 = arith.constant 0 : index
    %c0_19 = arith.constant 0 : index
    %77 = vector.load %arg6[%c0_18, %c0_19] : memref<1x128xf32, #tpu.memory_space<vmem>>, vector<1x128xf32>
    %78 = vector.broadcast %77 : vector<1x128xf32> to vector<32x128xf32>
    %79 = arith.addf %76, %78 : vector<32x128xf32>
    %cst_20 = arith.constant 0.000000e+00 : f32
    %80 = vector.broadcast %cst_20 : f32 to vector<32x128xf32>
    %81 = arith.cmpf ogt, %79, %80 : vector<32x128xf32>
    %82 = math.exp %79 : vector<32x128xf32>
    %cst_21 = arith.constant 1.000000e+00 : f32
    %83 = vector.broadcast %cst_21 : f32 to vector<32x128xf32>
    %84 = arith.subf %82, %83 : vector<32x128xf32>
    %85 = arith.select %81, %79, %84 : vector<32x128xi1>, vector<32x128xf32>
    %86 = arith.truncf %85 : vector<32x128xf32> to vector<32x128xbf16>
    %c0_22 = arith.constant 0 : index
    %c0_23 = arith.constant 0 : index
    %87 = vector.load %arg7[%c0_22, %c0_23] : memref<128x128xbf16, #tpu.memory_space<vmem>>, vector<128x128xbf16>
    %cst_24 = arith.constant dense<0.000000e+00> : vector<32x128xf32>
    %88 = tpu.matmul %86, %87, %cst_24 {dimension_numbers = #tpu.dot_dimension_numbers<[1], [0], [0], [1], [0, 0, 1, 1], [], []>} : vector<32x128xbf16>, vector<128x128xbf16>, vector<32x128xf32> -> vector<32x128xf32>
    %c0_25 = arith.constant 0 : index
    %c0_26 = arith.constant 0 : index
    %89 = vector.load %arg8[%c0_25, %c0_26] : memref<1x128xf32, #tpu.memory_space<vmem>>, vector<1x128xf32>
    %90 = vector.broadcast %89 : vector<1x128xf32> to vector<32x128xf32>
    %91 = arith.addf %88, %90 : vector<32x128xf32>
    %cst_27 = arith.constant 0.000000e+00 : f32
    %92 = vector.broadcast %cst_27 : f32 to vector<32x128xf32>
    %93 = arith.cmpf ogt, %91, %92 : vector<32x128xf32>
    %94 = math.exp %91 : vector<32x128xf32>
    %cst_28 = arith.constant 1.000000e+00 : f32
    %95 = vector.broadcast %cst_28 : f32 to vector<32x128xf32>
    %96 = arith.subf %94, %95 : vector<32x128xf32>
    %97 = arith.select %93, %91, %96 : vector<32x128xi1>, vector<32x128xf32>
    %98 = vector.extract_strided_slice %97 {offsets = [0, 0], sizes = [8, 128], strides = [1, 1]} : vector<32x128xf32> to vector<8x128xf32>
    %99 = vector.extract_strided_slice %97 {offsets = [8, 0], sizes = [8, 128], strides = [1, 1]} : vector<32x128xf32> to vector<8x128xf32>
    %100 = vector.extract_strided_slice %97 {offsets = [16, 0], sizes = [8, 128], strides = [1, 1]} : vector<32x128xf32> to vector<8x128xf32>
    %101 = vector.extract_strided_slice %97 {offsets = [24, 0], sizes = [8, 128], strides = [1, 1]} : vector<32x128xf32> to vector<8x128xf32>
    %102 = vector.extract_strided_slice %0 {offsets = [0, 0], sizes = [8, 1], strides = [1, 1]} : vector<8x8xf32> to vector<8x1xf32>
    %cst_29 = arith.constant -1.000000e+00 : f32
    %103 = vector.broadcast %cst_29 : f32 to vector<8x1xf32>
    %104 = arith.cmpf one, %102, %103 : vector<8x1xf32>
    %105 = arith.extui %104 : vector<8x1xi1> to vector<8x1xi32>
    %106 = arith.sitofp %105 : vector<8x1xi32> to vector<8x1xf32>
    %107 = vector.extract_strided_slice %0 {offsets = [0, 2], sizes = [8, 1], strides = [1, 1]} : vector<8x8xf32> to vector<8x1xf32>
    %cst_30 = arith.constant -1.000000e+00 : f32
    %108 = vector.broadcast %cst_30 : f32 to vector<8x1xf32>
    %109 = arith.cmpf one, %107, %108 : vector<8x1xf32>
    %110 = arith.extui %109 : vector<8x1xi1> to vector<8x1xi32>
    %111 = arith.sitofp %110 : vector<8x1xi32> to vector<8x1xf32>
    %112 = vector.extract_strided_slice %0 {offsets = [0, 4], sizes = [8, 1], strides = [1, 1]} : vector<8x8xf32> to vector<8x1xf32>
    %cst_31 = arith.constant -1.000000e+00 : f32
    %113 = vector.broadcast %cst_31 : f32 to vector<8x1xf32>
    %114 = arith.cmpf one, %112, %113 : vector<8x1xf32>
    %115 = arith.extui %114 : vector<8x1xi1> to vector<8x1xi32>
    %116 = arith.sitofp %115 : vector<8x1xi32> to vector<8x1xf32>
    %117 = vector.extract_strided_slice %0 {offsets = [0, 6], sizes = [8, 1], strides = [1, 1]} : vector<8x8xf32> to vector<8x1xf32>
    %cst_32 = arith.constant -1.000000e+00 : f32
    %118 = vector.broadcast %cst_32 : f32 to vector<8x1xf32>
    %119 = arith.cmpf one, %117, %118 : vector<8x1xf32>
    %120 = arith.extui %119 : vector<8x1xi1> to vector<8x1xi32>
    %121 = arith.sitofp %120 : vector<8x1xi32> to vector<8x1xf32>
    %122 = arith.addf %106, %111 : vector<8x1xf32>
    %123 = arith.addf %122, %116 : vector<8x1xf32>
    %124 = arith.addf %123, %121 : vector<8x1xf32>
    %cst_33 = arith.constant 4.000000e+00 : f32
    %125 = vector.broadcast %cst_33 : f32 to vector<8x1xf32>
    %126 = arith.cmpf oeq, %124, %125 : vector<8x1xf32>
    %cst_34 = arith.constant 2.500000e-01 : f32
    %cst_35 = arith.constant 0.000000e+00 : f32
    %127 = vector.broadcast %cst_34 : f32 to vector<8x1xf32>
    %128 = vector.broadcast %cst_35 : f32 to vector<8x1xf32>
    %129 = arith.select %126, %127, %128 : vector<8x1xi1>, vector<8x1xf32>
    %cst_36 = arith.constant 2.000000e+00 : f32
    %130 = vector.broadcast %cst_36 : f32 to vector<8x1xf32>
    %131 = arith.cmpf oeq, %124, %130 : vector<8x1xf32>
    %cst_37 = arith.constant 5.000000e-01 : f32
    %cst_38 = arith.constant 0.000000e+00 : f32
    %132 = vector.broadcast %cst_37 : f32 to vector<8x1xf32>
    %133 = vector.broadcast %cst_38 : f32 to vector<8x1xf32>
    %134 = arith.select %131, %132, %133 : vector<8x1xi1>, vector<8x1xf32>
    %135 = arith.addf %98, %99 : vector<8x128xf32>
    %136 = arith.addf %135, %100 : vector<8x128xf32>
    %137 = arith.addf %136, %101 : vector<8x128xf32>
    %138 = vector.broadcast %129 : vector<8x1xf32> to vector<8x128xf32>
    %139 = arith.mulf %138, %137 : vector<8x128xf32>
    %140 = arith.addf %98, %99 : vector<8x128xf32>
    %141 = vector.broadcast %134 : vector<8x1xf32> to vector<8x128xf32>
    %142 = arith.mulf %141, %140 : vector<8x128xf32>
    %143 = arith.addf %139, %142 : vector<8x128xf32>
    %cst_39 = arith.constant 4.000000e+00 : f32
    %144 = vector.broadcast %cst_39 : f32 to vector<8x1xf32>
    %145 = arith.mulf %129, %144 : vector<8x1xf32>
    %cst_40 = arith.constant 2.000000e+00 : f32
    %146 = vector.broadcast %cst_40 : f32 to vector<8x1xf32>
    %147 = arith.mulf %134, %146 : vector<8x1xf32>
    %148 = arith.addf %145, %147 : vector<8x1xf32>
    %149 = arith.truncf %143 : vector<8x128xf32> to vector<8x128xbf16>
    %c0_41 = arith.constant 0 : index
    %c0_42 = arith.constant 0 : index
    %150 = vector.load %arg9[%c0_41, %c0_42] : memref<128x256xbf16, #tpu.memory_space<vmem>>, vector<128x256xbf16>
    %cst_43 = arith.constant dense<0.000000e+00> : vector<8x256xf32>
    %151 = tpu.matmul %149, %150, %cst_43 {dimension_numbers = #tpu.dot_dimension_numbers<[1], [0], [0], [1], [0, 0, 1, 1], [], []>} : vector<8x128xbf16>, vector<128x256xbf16>, vector<8x256xf32> -> vector<8x256xf32>
    %c0_44 = arith.constant 0 : index
    %c0_45 = arith.constant 0 : index
    %152 = vector.load %arg10[%c0_44, %c0_45] : memref<1x256xf32, #tpu.memory_space<vmem>>, vector<1x256xf32>
    %153 = vector.broadcast %148 : vector<8x1xf32> to vector<8x256xf32>
    %154 = vector.broadcast %152 : vector<1x256xf32> to vector<8x256xf32>
    %155 = arith.mulf %153, %154 : vector<8x256xf32>
    %156 = arith.addf %151, %155 : vector<8x256xf32>
    %c0_46 = arith.constant 0 : index
    %c0_47 = arith.constant 0 : index
    %157 = vector.load %arg11[%c0_46, %c0_47] : memref<1x256xf32, #tpu.memory_space<vmem>>, vector<1x256xf32>
    %158 = vector.broadcast %1 : vector<8x1xf32> to vector<8x256xf32>
    %159 = vector.broadcast %157 : vector<1x256xf32> to vector<8x256xf32>
    %160 = arith.mulf %158, %159 : vector<8x256xf32>
    %161 = arith.addf %156, %160 : vector<8x256xf32>
    %c0_48 = arith.constant 0 : index
    %c0_49 = arith.constant 0 : index
    %162 = vector.load %arg12[%c0_48, %c0_49] : memref<1x256xf32, #tpu.memory_space<vmem>>, vector<1x256xf32>
    %163 = vector.broadcast %162 : vector<1x256xf32> to vector<8x256xf32>
    %164 = arith.addf %161, %163 : vector<8x256xf32>
    %cst_50 = arith.constant 0.000000e+00 : f32
    %165 = vector.broadcast %cst_50 : f32 to vector<8x256xf32>
    %166 = arith.cmpf ogt, %164, %165 : vector<8x256xf32>
    %167 = math.exp %164 : vector<8x256xf32>
    %cst_51 = arith.constant 1.000000e+00 : f32
    %168 = vector.broadcast %cst_51 : f32 to vector<8x256xf32>
    %169 = arith.subf %167, %168 : vector<8x256xf32>
    %170 = arith.select %166, %164, %169 : vector<8x256xi1>, vector<8x256xf32>
    %171 = arith.truncf %170 : vector<8x256xf32> to vector<8x256xbf16>
    %c0_52 = arith.constant 0 : index
    %c0_53 = arith.constant 0 : index
    %172 = vector.load %arg13[%c0_52, %c0_53] : memref<256x256xbf16, #tpu.memory_space<vmem>>, vector<256x256xbf16>
    %cst_54 = arith.constant dense<0.000000e+00> : vector<8x256xf32>
    %173 = tpu.matmul %171, %172, %cst_54 {dimension_numbers = #tpu.dot_dimension_numbers<[1], [0], [0], [1], [0, 0, 1, 1], [], []>} : vector<8x256xbf16>, vector<256x256xbf16>, vector<8x256xf32> -> vector<8x256xf32>
    %c0_55 = arith.constant 0 : index
    %c0_56 = arith.constant 0 : index
    %174 = vector.load %arg14[%c0_55, %c0_56] : memref<1x256xf32, #tpu.memory_space<vmem>>, vector<1x256xf32>
    %175 = vector.broadcast %174 : vector<1x256xf32> to vector<8x256xf32>
    %176 = arith.addf %173, %175 : vector<8x256xf32>
    %cst_57 = arith.constant 0.000000e+00 : f32
    %177 = vector.broadcast %cst_57 : f32 to vector<8x256xf32>
    %178 = arith.cmpf ogt, %176, %177 : vector<8x256xf32>
    %179 = math.exp %176 : vector<8x256xf32>
    %cst_58 = arith.constant 1.000000e+00 : f32
    %180 = vector.broadcast %cst_58 : f32 to vector<8x256xf32>
    %181 = arith.subf %179, %180 : vector<8x256xf32>
    %182 = arith.select %178, %176, %181 : vector<8x256xi1>, vector<8x256xf32>
    %183 = arith.truncf %182 : vector<8x256xf32> to vector<8x256xbf16>
    %c0_59 = arith.constant 0 : index
    %c0_60 = arith.constant 0 : index
    %184 = vector.load %arg15[%c0_59, %c0_60] : memref<256x256xbf16, #tpu.memory_space<vmem>>, vector<256x256xbf16>
    %cst_61 = arith.constant dense<0.000000e+00> : vector<8x256xf32>
    %185 = tpu.matmul %183, %184, %cst_61 {dimension_numbers = #tpu.dot_dimension_numbers<[1], [0], [0], [1], [0, 0, 1, 1], [], []>} : vector<8x256xbf16>, vector<256x256xbf16>, vector<8x256xf32> -> vector<8x256xf32>
    %c0_62 = arith.constant 0 : index
    %c0_63 = arith.constant 0 : index
    %186 = vector.load %arg16[%c0_62, %c0_63] : memref<1x256xf32, #tpu.memory_space<vmem>>, vector<1x256xf32>
    %187 = vector.broadcast %186 : vector<1x256xf32> to vector<8x256xf32>
    %188 = arith.addf %185, %187 : vector<8x256xf32>
    %cst_64 = arith.constant 0.000000e+00 : f32
    %189 = vector.broadcast %cst_64 : f32 to vector<8x256xf32>
    %190 = arith.cmpf ogt, %188, %189 : vector<8x256xf32>
    %191 = math.exp %188 : vector<8x256xf32>
    %cst_65 = arith.constant 1.000000e+00 : f32
    %192 = vector.broadcast %cst_65 : f32 to vector<8x256xf32>
    %193 = arith.subf %191, %192 : vector<8x256xf32>
    %194 = arith.select %190, %188, %193 : vector<8x256xi1>, vector<8x256xf32>
    %195 = arith.truncf %194 : vector<8x256xf32> to vector<8x256xbf16>
    %c0_66 = arith.constant 0 : index
    %c0_67 = arith.constant 0 : index
    %196 = vector.load %arg17[%c0_66, %c0_67] : memref<256x256xbf16, #tpu.memory_space<vmem>>, vector<256x256xbf16>
    %cst_68 = arith.constant dense<0.000000e+00> : vector<8x256xf32>
    %197 = tpu.matmul %195, %196, %cst_68 {dimension_numbers = #tpu.dot_dimension_numbers<[1], [0], [0], [1], [0, 0, 1, 1], [], []>} : vector<8x256xbf16>, vector<256x256xbf16>, vector<8x256xf32> -> vector<8x256xf32>
    %c0_69 = arith.constant 0 : index
    %c0_70 = arith.constant 0 : index
    %198 = vector.load %arg18[%c0_69, %c0_70] : memref<1x256xf32, #tpu.memory_space<vmem>>, vector<1x256xf32>
    %199 = vector.broadcast %198 : vector<1x256xf32> to vector<8x256xf32>
    %200 = arith.addf %197, %199 : vector<8x256xf32>
    %cst_71 = arith.constant 0.000000e+00 : f32
    %201 = vector.broadcast %cst_71 : f32 to vector<8x256xf32>
    %202 = arith.cmpf ogt, %200, %201 : vector<8x256xf32>
    %203 = math.exp %200 : vector<8x256xf32>
    %cst_72 = arith.constant 1.000000e+00 : f32
    %204 = vector.broadcast %cst_72 : f32 to vector<8x256xf32>
    %205 = arith.subf %203, %204 : vector<8x256xf32>
    %206 = arith.select %202, %200, %205 : vector<8x256xi1>, vector<8x256xf32>
    %207 = arith.truncf %206 : vector<8x256xf32> to vector<8x256xbf16>
    %c0_73 = arith.constant 0 : index
    %c0_74 = arith.constant 0 : index
    %208 = vector.load %arg19[%c0_73, %c0_74] : memref<256x256xbf16, #tpu.memory_space<vmem>>, vector<256x256xbf16>
    %cst_75 = arith.constant dense<0.000000e+00> : vector<8x256xf32>
    %209 = tpu.matmul %207, %208, %cst_75 {dimension_numbers = #tpu.dot_dimension_numbers<[1], [0], [0], [1], [0, 0, 1, 1], [], []>} : vector<8x256xbf16>, vector<256x256xbf16>, vector<8x256xf32> -> vector<8x256xf32>
    %c0_76 = arith.constant 0 : index
    %c0_77 = arith.constant 0 : index
    %210 = vector.load %arg20[%c0_76, %c0_77] : memref<1x256xf32, #tpu.memory_space<vmem>>, vector<1x256xf32>
    %211 = vector.broadcast %210 : vector<1x256xf32> to vector<8x256xf32>
    %212 = arith.addf %209, %211 : vector<8x256xf32>
    %cst_78 = arith.constant 0.000000e+00 : f32
    %213 = vector.broadcast %cst_78 : f32 to vector<8x256xf32>
    %214 = arith.cmpf ogt, %212, %213 : vector<8x256xf32>
    %215 = math.exp %212 : vector<8x256xf32>
    %cst_79 = arith.constant 1.000000e+00 : f32
    %216 = vector.broadcast %cst_79 : f32 to vector<8x256xf32>
    %217 = arith.subf %215, %216 : vector<8x256xf32>
    %218 = arith.select %214, %212, %217 : vector<8x256xi1>, vector<8x256xf32>
    %219 = arith.truncf %218 : vector<8x256xf32> to vector<8x256xbf16>
    %c0_80 = arith.constant 0 : index
    %c0_81 = arith.constant 0 : index
    %220 = vector.load %arg21[%c0_80, %c0_81] : memref<256x2xbf16, #tpu.memory_space<vmem>>, vector<256x2xbf16>
    %cst_82 = arith.constant dense<0.000000e+00> : vector<8x2xf32>
    %221 = tpu.matmul %219, %220, %cst_82 {dimension_numbers = #tpu.dot_dimension_numbers<[1], [0], [0], [1], [0, 0, 1, 1], [], []>} : vector<8x256xbf16>, vector<256x2xbf16>, vector<8x2xf32> -> vector<8x2xf32>
    %c0_83 = arith.constant 0 : index
    %c0_84 = arith.constant 0 : index
    %222 = vector.load %arg22[%c0_83, %c0_84] : memref<1x2xf32, #tpu.memory_space<vmem>>, vector<1x2xf32>
    %223 = vector.broadcast %222 : vector<1x2xf32> to vector<8x2xf32>
    %224 = arith.addf %221, %223 : vector<8x2xf32>
    %c0_85 = arith.constant 0 : index
    %c0_86 = arith.constant 0 : index
    %225 = vector.load %arg23[%c0_85, %c0_86] : memref<8x2xf32, #tpu.memory_space<vmem>>, vector<8x2xf32>
    tpu.vector_store %arg23[%c0_85, %c0_86], %224 {strides = array<i32>} : memref<8x2xf32, #tpu.memory_space<vmem>>, vector<8x2xf32>,
    return
  }
  func.func @transform_0(%arg0: i32) -> (i32, i32) {
    %c0_i32 = arith.constant 0 : i32
    %c0_i32_0 = arith.constant 0 : i32
    return %arg0, %c0_i32 : i32, i32
  }
  func.func @transform_1(%arg0: i32) -> (i32, i32) {
    %c0_i32 = arith.constant 0 : i32
    %c0_i32_0 = arith.constant 0 : i32
    return %arg0, %c0_i32 : i32, i32
  }
  func.func @transform_2(%arg0: i32) -> (i32, i32) {
    %c0_i32 = arith.constant 0 : i32
    %c0_i32_0 = arith.constant 0 : i32
    %c0_i32_1 = arith.constant 0 : i32
    return %c0_i32, %c0_i32_0 : i32, i32
  }
  func.func @transform_3(%arg0: i32) -> (i32, i32) {
    %c0_i32 = arith.constant 0 : i32
    %c0_i32_0 = arith.constant 0 : i32
    %c0_i32_1 = arith.constant 0 : i32
    return %c0_i32, %c0_i32_0 : i32, i32
  }
  func.func @transform_4(%arg0: i32) -> (i32, i32) {
    %c0_i32 = arith.constant 0 : i32
    %c0_i32_0 = arith.constant 0 : i32
    %c0_i32_1 = arith.constant 0 : i32
    return %c0_i32, %c0_i32_0 : i32, i32
  }
  func.func @transform_5(%arg0: i32) -> (i32, i32) {
    %c0_i32 = arith.constant 0 : i32
    %c0_i32_0 = arith.constant 0 : i32
    %c0_i32_1 = arith.constant 0 : i32
    return %c0_i32, %c0_i32_0 : i32, i32
  }
  func.func @transform_6(%arg0: i32) -> (i32, i32) {
    %c0_i32 = arith.constant 0 : i32
    %c0_i32_0 = arith.constant 0 : i32
    %c0_i32_1 = arith.constant 0 : i32
    return %c0_i32, %c0_i32_0 : i32, i32
  }
  func.func @transform_7(%arg0: i32) -> (i32, i32) {
    %c0_i32 = arith.constant 0 : i32
    %c0_i32_0 = arith.constant 0 : i32
    %c0_i32_1 = arith.constant 0 : i32
    return %c0_i32, %c0_i32_0 : i32, i32
  }
  func.func @transform_8(%arg0: i32) -> (i32, i32) {
    %c0_i32 = arith.constant 0 : i32
    %c0_i32_0 = arith.constant 0 : i32
    %c0_i32_1 = arith.constant 0 : i32
    return %c0_i32, %c0_i32_0 : i32, i32
  }
  func.func @transform_9(%arg0: i32) -> (i32, i32) {
    %c0_i32 = arith.constant 0 : i32
    %c0_i32_0 = arith.constant 0 : i32
    %c0_i32_1 = arith.constant 0 : i32
    return %c0_i32, %c0_i32_0 : i32, i32
  }
  func.func @transform_10(%arg0: i32) -> (i32, i32) {
    %c0_i32 = arith.constant 0 : i32
    %c0_i32_0 = arith.constant 0 : i32
    %c0_i32_1 = arith.constant 0 : i32
    return %c0_i32, %c0_i32_0 : i32, i32
  }
  func.func @transform_11(%arg0: i32) -> (i32, i32) {
    %c0_i32 = arith.constant 0 : i32
    %c0_i32_0 = arith.constant 0 : i32
    %c0_i32_1 = arith.constant 0 : i32
    return %c0_i32, %c0_i32_0 : i32, i32
  }
  func.func @transform_12(%arg0: i32) -> (i32, i32) {
    %c0_i32 = arith.constant 0 : i32
    %c0_i32_0 = arith.constant 0 : i32
    %c0_i32_1 = arith.constant 0 : i32
    return %c0_i32, %c0_i32_0 : i32, i32
  }
  func.func @transform_13(%arg0: i32) -> (i32, i32) {
    %c0_i32 = arith.constant 0 : i32
    %c0_i32_0 = arith.constant 0 : i32
    %c0_i32_1 = arith.constant 0 : i32
    return %c0_i32, %c0_i32_0 : i32, i32
  }
  func.func @transform_14(%arg0: i32) -> (i32, i32) {
    %c0_i32 = arith.constant 0 : i32
    %c0_i32_0 = arith.constant 0 : i32
    %c0_i32_1 = arith.constant 0 : i32
    return %c0_i32, %c0_i32_0 : i32, i32
  }
  func.func @transform_15(%arg0: i32) -> (i32, i32) {
    %c0_i32 = arith.constant 0 : i32
    %c0_i32_0 = arith.constant 0 : i32
    %c0_i32_1 = arith.constant 0 : i32
    return %c0_i32, %c0_i32_0 : i32, i32
  }
  func.func @transform_16(%arg0: i32) -> (i32, i32) {
    %c0_i32 = arith.constant 0 : i32
    %c0_i32_0 = arith.constant 0 : i32
    %c0_i32_1 = arith.constant 0 : i32
    return %c0_i32, %c0_i32_0 : i32, i32
  }
  func.func @transform_17(%arg0: i32) -> (i32, i32) {
    %c0_i32 = arith.constant 0 : i32
    %c0_i32_0 = arith.constant 0 : i32
    %c0_i32_1 = arith.constant 0 : i32
    return %c0_i32, %c0_i32_0 : i32, i32
  }
  func.func @transform_18(%arg0: i32) -> (i32, i32) {
    %c0_i32 = arith.constant 0 : i32
    %c0_i32_0 = arith.constant 0 : i32
    %c0_i32_1 = arith.constant 0 : i32
    return %c0_i32, %c0_i32_0 : i32, i32
  }
  func.func @transform_19(%arg0: i32) -> (i32, i32) {
    %c0_i32 = arith.constant 0 : i32
    %c0_i32_0 = arith.constant 0 : i32
    %c0_i32_1 = arith.constant 0 : i32
    return %c0_i32, %c0_i32_0 : i32, i32
  }
  func.func @transform_20(%arg0: i32) -> (i32, i32) {
    %c0_i32 = arith.constant 0 : i32
    %c0_i32_0 = arith.constant 0 : i32
    %c0_i32_1 = arith.constant 0 : i32
    return %c0_i32, %c0_i32_0 : i32, i32
  }
  func.func @transform_21(%arg0: i32) -> (i32, i32) {
    %c0_i32 = arith.constant 0 : i32
    %c0_i32_0 = arith.constant 0 : i32
    %c0_i32_1 = arith.constant 0 : i32
    return %c0_i32, %c0_i32_0 : i32, i32
  }
  func.func @transform_22(%arg0: i32) -> (i32, i32) {
    %c0_i32 = arith.constant 0 : i32
    %c0_i32_0 = arith.constant 0 : i32
    return %arg0, %c0_i32 : i32, i32
  }
}

</mosaic_0001>

<bundles_post_ra>
// kernel: tpu_custom_call.1
= control target key start
LH: loop header
LB: loop body
LE: loop exit
PB: predicated region body
PF: predicated region fallthrough
CT: control target
= control target key end

     0   :  { %s4330_s0 = inlined_call_operand.vmem [shape: f32[16,8], index: 0, kind: input, shape index: {}]   ;;  %s4331_s1 = inlined_call_operand.vmem [shape: f32[16,1], index: 1, kind: input, shape index: {}]   ;;  %s4332_s2 = inlined_call_operand.vmem [shape: f32[2,128], index: 2, kind: input, shape index: {}]   ;;  %s4333_s3 = inlined_call_operand.hbm [shape: f32[1,128], index: 3, kind: input, shape index: {}]   ;;  %s4334_s4 = inlined_call_operand.vmem [shape: bf16[128,128], index: 4, kind: input, shape index: {}]   ;;  %s4335_s5 = inlined_call_operand.hbm [shape: f32[1,128], index: 5, kind: input, shape index: {}]   ;;  %s4336_s6 = inlined_call_operand.hbm [shape: bf16[128,128], index: 6, kind: input, shape index: {}]   ;;  %s4337_s7 = inlined_call_operand.hbm [shape: f32[1,128], index: 7, kind: input, shape index: {}]   ;;  %s4338_s8 = inlined_call_operand.vmem [shape: bf16[128,256], index: 8, kind: input, shape index: {}]   ;;  %s4339_s9 = inlined_call_operand.vmem [shape: f32[1,256], index: 9, kind: input, shape index: {}]   ;;  %s4340_s10 = inlined_call_operand.vmem [shape: f32[1,256], index: 10, kind: input, shape index: {}]   ;;  %s4341_s11 = inlined_call_operand.vmem [shape: f32[1,256], index: 11, kind: input, shape index: {}]   ;;  %s4342_s12 = inlined_call_operand.hbm [shape: bf16[256,256], index: 12, kind: input, shape index: {}]   ;;  %s4343_s13 = inlined_call_operand.vmem [shape: f32[1,256], index: 13, kind: input, shape index: {}]   ;;  %s4344_s14 = inlined_call_operand.hbm [shape: bf16[256,256], index: 14, kind: input, shape index: {}]   ;;  %s4345_s15 = inlined_call_operand.vmem [shape: f32[1,256], index: 15, kind: input, shape index: {}]   ;;  %s4346_s16 = inlined_call_operand.hbm [shape: bf16[256,256], index: 16, kind: input, shape index: {}]   ;;  %s4347_s17 = inlined_call_operand.vmem [shape: f32[1,256], index: 17, kind: input, shape index: {}]   ;;  %s4348_s18 = inlined_call_operand.hbm [shape: bf16[256,256], index: 18, kind: input, shape index: {}]   ;;  %s4349_s19 = inlined_call_operand.vmem [shape: f32[1,256], index: 19, kind: input, shape index: {}]   ;;  %s4350_s20 = inlined_call_operand.vmem [shape: bf16[256,2], index: 20, kind: input, shape index: {}]   ;;  %s4351_s21 = inlined_call_operand.vmem [shape: f32[1,2], index: 21, kind: input, shape index: {}]   ;;  %s4352_s22 = inlined_call_operand.vmem [shape: f32[16,2], index: 22, kind: output, shape index: {}]  }
   0x1   :  { %4366 = sst [smem:[#allocation21_spill]] %s4330_s0 }
   0x2   :  { %4367 = sst [smem:[#allocation22_spill]] %s4331_s1 }
   0x3   :  { %4368 = sst [smem:[#allocation23_spill]] %s4332_s2 }
   0x4   :  { %4369 = sst [smem:[#allocation24_spill]] %s4333_s3 }
   0x5   :  { %4370 = sst [smem:[#allocation25_spill]] %s4334_s4 }
   0x6   :  { %4371 = sst [smem:[#allocation26_spill]] %s4335_s5 }
   0x7   :  { %4372 = sst [smem:[#allocation27_spill]] %s4336_s6 }
   0x8   :  { %4373 = sst [smem:[#allocation28_spill]] %s4337_s7 }
   0x9   :  { %4374 = sst [smem:[#allocation29_spill]] %s4344_s14 }
   0xa   :  { %4375 = sst [smem:[#allocation30_spill]] %s4349_s19 }
   0xb   :  { %4376 = sst [smem:[#allocation31_spill]] %s4351_s21 }
   0xc   :  { %4377 = sst [smem:[#allocation32_spill]] %s4352_s22 }
   0xd   :  { %27 = vsyncpa [#allocation3], 0 }
   0xe   :  { %28 = vsyncpa [#allocation5], 0 }
   0xf   :  { %29 = vsyncpa [#allocation8], 0 }
  0x10   :  { %30 = vsyncpa [#allocation11], 0 }
  0x11   :  { %31 = vsyncpa [#allocation14], 0  ;;  %s3888_s3 = smov 0  }
  0x12 LB: > { %4378 = sst [smem:[#allocation20_spill]] %s3747_s3  ;;  %s3749_s28 = smov [#allocation4]   ;;  %s3747_s3 = sphi %s3888_s3, %s37_s3  }
  0x13   : > { %s570_s29 = sshll.u32 %s3749_s28, 4  ;;  %s3894_s30 = sadd.s32 4294967295, %s3747_s3   ;;  %s3899_s29 = int_to_ptr.vmem [resolvable:$true] %s570_s29 }
  0x14   : > { %p2774_p0 = scmp.ge.s32.totalorder %s3747_s3, 1  ;;  %p540_p1 = scmp.lt.s32.totalorder %s3747_s3, 3 }
  0x15   : > { %p4359_p2 = scmp.eq.s32.totalorder %s3894_s30, 0  ;;  %s3750_s0 = smov [#allocation7]  }
  0x16   : > { %p3901_p3 = pnand %p2774_p0, %p540_p1  ;;  %s594_s23 = sshll.u32 %s3750_s0, 4  ;;  %s3907_s23 = int_to_ptr.vmem [resolvable:$true] %s594_s23 }
  0x17   : > { %s3751_s5 = smov [#allocation10]   ;;  %s3752_s6 = smov [#allocation2]  }
  0x18   : > { %s4379_s4 = scalar_select %p3901_p3, 1, 0 }
  0x19   : > { %p3117_p4 = pneg %p3901_p3  ;;  %s632_s24 = sshll.u32 %s3751_s5, 4  ;;  %s3915_s24 = int_to_ptr.vmem [resolvable:$true] %s632_s24 }
  0x1a   : > { %s3917_s25 = sshll.u32 %s3752_s6, 4  ;;  %s4381_s27 = sld [smem:[#allocation26_spill]]  ;;  %s557_s25 = int_to_ptr.vmem [resolvable:$true] %s3917_s25 }
  0x1b   : > { %p3911_p5 = pnand %p4359_p2, %p3117_p4 }
  0x1d   : > { %p3927_p7 = pneg %p3911_p5 }
  0x20   : > { %s3497_s28 = scalar_lea.hbm %s4381_s27, 16 }
  0x21   : > { %p3498_p6 = scmp.ne.s32.totalorder %s4381_s27, %s3497_s28  ;;  %p3504_p10 = scmp.lt.u32.totalorder %s3497_s28, %s4381_s27 }
  0x23   : > { %p3500_p8 = pnand %p3927_p7, %p3498_p6 }
  0x25   : > { %p3501_p9 = pneg %p3500_p8 }
  0x27   : > { %p3506_p11 = pnand %p3504_p10, %p3501_p9 }
  0x29   : > { %3509 = shalt.err (!%p3506_p11)
}
  0x2a   : > { %s3510_s3 = scalar_lea.vmem %s3899_s29, 16  ;;  %s3517_s26 = scalar_lea.vmem %s3899_s29, 32 }
  0x2b   : > { %p3511_p12 = scmp.ne.s32.totalorder %s3899_s29, %s3510_s3  ;;  %p3518_p1 = scmp.lt.s32.totalorder %s3899_s29, %s3899_s29 }
  0x2c   : > { %p3519_p4 = scmp.lt.s32.totalorder %s3517_s26, %s3510_s3 }
  0x2d   : > { %p3513_p13 = pnand %p3511_p12, %p3927_p7 }
  0x2e   : > { %p3520_p6 = por %p3519_p4, %p3518_p1 }
  0x2f   : > { %p3514_p0 = pneg %p3513_p13 }
  0x31   : > { %p3521_p8 = pnand %p3520_p6, %p3514_p0 }
  0x33   : > { %3524 = shalt.err (!%p3521_p8)
}
  0x34   : > { %3123 = dma.hbm_to_vmem [thread:$0]  (!%p3911_p5), %s4381_s27, 16, %s3899_s29, [#allocation5]  }
  0x35   : > { %s4383_s7 = sld [smem:[#allocation28_spill]] }
  0x3b   : > { %s3525_s6 = scalar_lea.hbm %s4383_s7, 16 }
  0x3c   : > { %p3526_p9 = scmp.ne.s32.totalorder %s4383_s7, %s3525_s6  ;;  %p3532_p12 = scmp.lt.u32.totalorder %s3525_s6, %s4383_s7 }
  0x3e   : > { %p3528_p10 = pnand %p3526_p9, %p3927_p7 }
  0x40   : > { %p3529_p11 = pneg %p3528_p10 }
  0x42   : > { %p3534_p13 = pnand %p3532_p12, %p3529_p11 }
  0x44   : > { %3537 = shalt.err (!%p3534_p13)
}
  0x45   : > { %s3538_s29 = scalar_lea.vmem %s3907_s23, 16  ;;  %s3545_s19 = scalar_lea.vmem %s3907_s23, 32 }
  0x46   : > { %p3539_p0 = scmp.ne.s32.totalorder %s3907_s23, %s3538_s29  ;;  %p3546_p6 = scmp.lt.s32.totalorder %s3907_s23, %s3907_s23 }
  0x47   : > { %p3547_p8 = scmp.lt.s32.totalorder %s3545_s19, %s3538_s29 }
  0x48   : > { %p3541_p1 = pnand %p3539_p0, %p3927_p7 }
  0x49   : > { %p3548_p9 = por %p3547_p8, %p3546_p6 }
  0x4a   : > { %p3542_p4 = pneg %p3541_p1 }
  0x4c   : > { %p3549_p10 = pnand %p3548_p9, %p3542_p4 }
  0x4e   : > { %3552 = shalt.err (!%p3549_p10)
}
  0x4f   : > { %3129 = dma.hbm_to_vmem [thread:$0]  (!%p3911_p5), %s4383_s7, 16, %s3907_s23, [#allocation8]  }
  0x50   : > { %s4384_s14 = sld [smem:[#allocation29_spill]] }
  0x56   : > { %s3553_s5 = scalar_lea.hbm %s4384_s14, 4096 }
  0x57   : > { %p3554_p11 = scmp.ne.s32.totalorder %s4384_s14, %s3553_s5  ;;  %p3560_p0 = scmp.lt.u32.totalorder %s3553_s5, %s4384_s14 }
  0x59   : > { %p3556_p12 = pnand %p3554_p11, %p3927_p7 }
  0x5b   : > { %p3557_p13 = pneg %p3556_p12 }
  0x5d   : > { %p3562_p1 = pnand %p3560_p0, %p3557_p13 }
  0x5f   : > { %3565 = shalt.err (!%p3562_p1)
}
  0x60   : > { %s3566_s23 = scalar_lea.vmem %s3915_s24, 4096  ;;  %p3574_p9 = scmp.lt.s32.totalorder %s3915_s24, %s3915_s24 }
  0x61   : > { %p3567_p4 = scmp.ne.s32.totalorder %s3915_s24, %s3566_s23  ;;  %p3575_p10 = scmp.lt.s32.totalorder %s3566_s23, %s3566_s23 }
  0x63   : > { %p3569_p6 = pnand %p3567_p4, %p3927_p7  ;;  %p3576_p11 = por %p3575_p10, %p3574_p9 }
  0x65   : > { %p3570_p8 = pneg %p3569_p6 }
  0x67   : > { %p3577_p12 = pnand %p3576_p11, %p3570_p8 }
  0x69   : > { %3580 = shalt.err (!%p3577_p12)
}
  0x6a   : > { %s4361_s19 = smov 128   ;;  %s4363_s21 = smov 8  }
  0x6b   : > { %3135 = dma.hbm_to_vmem [thread:$0]  (!%p3911_p5), %s4384_s14, 4096, %s3915_s24, [#allocation11], %s4361_s19, %s4361_s19, %s4363_s21  }
  0x6c   : > { %s4385_s6 = sld [smem:[#allocation24_spill]] }
  0x72   : > { %s3581_s3 = scalar_lea.hbm %s4385_s6, 16 }
  0x73   : > { %p3582_p13 = scmp.ne.s32.totalorder %s4385_s6, %s3581_s3  ;;  %p3588_p4 = scmp.lt.u32.totalorder %s3581_s3, %s4385_s6 }
  0x75   : > { %p3584_p0 = pnand %p3582_p13, %p3927_p7 }
  0x77   : > { %p3585_p1 = pneg %p3584_p0 }
  0x79   : > { %p3590_p6 = pnand %p3588_p4, %p3585_p1 }
  0x7b   : > { %3593 = shalt.err (!%p3590_p6)
}
  0x7c   : > { %s3594_s2 = scalar_lea.vmem %s557_s25, 16  ;;  %s3601_s24 = scalar_lea.vmem %s557_s25, 32 }
  0x7d   : > { %p3595_p8 = scmp.ne.s32.totalorder %s557_s25, %s3594_s2  ;;  %p3602_p11 = scmp.lt.s32.totalorder %s557_s25, %s557_s25 }
  0x7e   : > { %p3603_p12 = scmp.lt.s32.totalorder %s3601_s24, %s3594_s2 }
  0x7f   : > { %p3597_p9 = pnand %p3595_p8, %p3927_p7 }
  0x80   : > { %p3604_p2 = por %p3603_p12, %p3602_p11 }
  0x81   : > { %p3598_p10 = pneg %p3597_p9 }
  0x83   : > { %p3605_p3 = pnand %p3604_p2, %p3598_p10 }
  0x85   : > { %3608 = shalt.err (!%p3605_p3)
}
  0x86   : > { %3120 = dma.hbm_to_vmem [thread:$0]  (!%p3911_p5), %s4385_s6, 16, %s557_s25, [#allocation3]  }
  0x87   : > { %s3755_s7 = smov [#allocation6]   ;;  %s4386_s29 = sld [smem:[#allocation27_spill]] }
  0x88   : > { %s580_s5 = sshll.u32 %s3755_s7, 4  ;;  %s581_s5 = int_to_ptr.vmem [resolvable:$true] %s580_s5 }
  0x8d   : > { %s3609_s23 = scalar_lea.hbm %s4386_s29, 1024 }
  0x8e   : > { %p3610_p13 = scmp.ne.s32.totalorder %s4386_s29, %s3609_s23  ;;  %p3616_p0 = scmp.lt.u32.totalorder %s3609_s23, %s4386_s29 }
  0x90   : > { %p3612_p2 = pnand %p3610_p13, %p3927_p7 }
  0x92   : > { %p3613_p3 = pneg %p3612_p2 }
  0x94   : > { %p3618_p1 = pnand %p3616_p0, %p3613_p3 }
  0x96   : > { %3621 = shalt.err (!%p3618_p1)
}
  0x97   : > { %s3622_s25 = scalar_lea.vmem %s581_s5, 1024  ;;  %p3630_p9 = scmp.lt.s32.totalorder %s581_s5, %s581_s5 }
  0x98   : > { %p3623_p4 = scmp.ne.s32.totalorder %s581_s5, %s3622_s25  ;;  %p3631_p10 = scmp.lt.s32.totalorder %s3622_s25, %s3622_s25 }
  0x9a   : > { %p3625_p6 = pnand %p3623_p4, %p3927_p7  ;;  %p3632_p11 = por %p3631_p10, %p3630_p9 }
  0x9c   : > { %p3626_p8 = pneg %p3625_p6 }
  0x9e   : > { %p3633_p12 = pnand %p3632_p11, %p3626_p8 }
  0xa0   : > { %3636 = shalt.err (!%p3633_p12)
}
  0xa1   : > { %s3756_s19 = smov 64   ;;  %s3757_s21 = smov 4  }
  0xa2   : > { %3126 = dma.hbm_to_vmem [thread:$0]  (!%p3911_p5), %s4386_s29, 1024, %s581_s5, [#allocation5], %s3756_s19, %s3756_s19, %s3757_s21  }
  0xa3   : > { %s3758_s7 = smov [#allocation9]   ;;  %s3759_s26 = smov [#allocation12]  }
  0xa4   : > { %s616_s3 = sshll.u32 %s3758_s7, 4  ;;  %s648_s23 = sshll.u32 %s3759_s26, 4  ;;  %s617_s3 = int_to_ptr.vmem [resolvable:$true] %s616_s3  ;;  %s4036_s23 = int_to_ptr.vmem [resolvable:$true] %s648_s23 }
  0xa5   : > { %s3637_s25 = scalar_lea.hbm %s4342_s12, 4096 }
  0xa6   : > { %p3638_p13 = scmp.ne.s32.totalorder %s4342_s12, %s3637_s25  ;;  %p3644_p0 = scmp.lt.u32.totalorder %s3637_s25, %s4342_s12 }
  0xa8   : > { %p3640_p2 = pnand %p3638_p13, %p3927_p7 }
  0xaa   : > { %p3641_p3 = pneg %p3640_p2 }
  0xac   : > { %p3646_p1 = pnand %p3644_p0, %p3641_p3 }
  0xae   : > { %3649 = shalt.err (!%p3646_p1)
}
  0xaf   : > { %s3650_s19 = scalar_lea.vmem %s617_s3, 4096  ;;  %p3658_p9 = scmp.lt.s32.totalorder %s617_s3, %s617_s3 }
  0xb0   : > { %p3651_p4 = scmp.ne.s32.totalorder %s617_s3, %s3650_s19  ;;  %p3659_p10 = scmp.lt.s32.totalorder %s3650_s19, %s3650_s19 }
  0xb2   : > { %p3653_p6 = pnand %p3651_p4, %p3927_p7  ;;  %p3660_p11 = por %p3659_p10, %p3658_p9 }
  0xb4   : > { %p3654_p8 = pneg %p3653_p6 }
  0xb6   : > { %p3661_p12 = pnand %p3660_p11, %p3654_p8 }
  0xb8   : > { %3664 = shalt.err (!%p3661_p12)
}
  0xb9   : > { %s4387_s14 = smov 8   ;;  %s4388_s6 = smov 128  }
  0xba   : > { %3132 = dma.hbm_to_vmem [thread:$0]  (!%p3911_p5), %s4342_s12, 4096, %s617_s3, [#allocation8], %s4388_s6, %s4388_s6, %s4387_s14  }
  0xbb   : > { %s3665_s2 = scalar_lea.hbm %s4346_s16, 4096 }
  0xbc   : > { %p3666_p13 = scmp.ne.s32.totalorder %s4346_s16, %s3665_s2  ;;  %p3672_p0 = scmp.lt.u32.totalorder %s3665_s2, %s4346_s16 }
  0xbe   : > { %p3668_p2 = pnand %p3666_p13, %p3927_p7 }
  0xc0   : > { %p3669_p3 = pneg %p3668_p2 }
  0xc2   : > { %p3674_p1 = pnand %p3672_p0, %p3669_p3 }
  0xc4   : > { %3677 = shalt.err (!%p3674_p1)
}
  0xc5   : > { %s3678_s3 = scalar_lea.vmem %s4036_s23, 4096  ;;  %p3686_p9 = scmp.lt.s32.totalorder %s4036_s23, %s4036_s23 }
  0xc6   : > { %p3679_p4 = scmp.ne.s32.totalorder %s4036_s23, %s3678_s3  ;;  %p3687_p10 = scmp.lt.s32.totalorder %s3678_s3, %s3678_s3 }
  0xc8   : > { %p3681_p6 = pnand %p3679_p4, %p3927_p7  ;;  %p3688_p11 = por %p3687_p10, %p3686_p9 }
  0xca   : > { %p3682_p8 = pneg %p3681_p6 }
  0xcc   : > { %p3689_p12 = pnand %p3688_p11, %p3682_p8 }
  0xce   : > { %3692 = shalt.err (!%p3689_p12)
}
  0xcf   : > { %3138 = dma.hbm_to_vmem [thread:$0]  (!%p3911_p5), %s4346_s16, 4096, %s4036_s23, [#allocation11], %s4388_s6, %s4388_s6, %s4387_s14  }
  0xd0   : > { %s3760_s0 = smov [#allocation13]   ;;  %s3693_s24 = scalar_lea.hbm %s4348_s18, 4096 }
  0xd1   : > { %s664_s7 = sshll.u32 %s3760_s0, 4  ;;  %p3694_p13 = scmp.ne.s32.totalorder %s4348_s18, %s3693_s24  ;;  %s665_s7 = int_to_ptr.vmem [resolvable:$true] %s664_s7 }
  0xd2   : > { %p3700_p0 = scmp.lt.u32.totalorder %s3693_s24, %s4348_s18 }
  0xd3   : > { %p3696_p2 = pnand %p3694_p13, %p3927_p7 }
  0xd5   : > { %p3697_p3 = pneg %p3696_p2 }
  0xd7   : > { %p3702_p1 = pnand %p3700_p0, %p3697_p3 }
  0xd9   : > { %3705 = shalt.err (!%p3702_p1)
}
  0xda   : > { %s3706_s23 = scalar_lea.vmem %s665_s7, 4096  ;;  %p3714_p9 = scmp.lt.s32.totalorder %s665_s7, %s665_s7 }
  0xdb   : > { %p3707_p4 = scmp.ne.s32.totalorder %s665_s7, %s3706_s23  ;;  %p3715_p10 = scmp.lt.s32.totalorder %s3706_s23, %s3706_s23 }
  0xdd   : > { %p3709_p6 = pnand %p3707_p4, %p3927_p7  ;;  %p3716_p11 = por %p3715_p10, %p3714_p9 }
  0xdf   : > { %p3710_p8 = pneg %p3709_p6 }
  0xe1   : > { %p3717_p12 = pnand %p3716_p11, %p3710_p8 }
  0xe3   : > { %3720 = shalt.err (!%p3717_p12)
}
  0xe4   : > { %3141 = dma.hbm_to_vmem [thread:$0]  (!%p3911_p5), %s4348_s18, 4096, %s665_s7, [#allocation14], %s4388_s6, %s4388_s6, %s4387_s14  }
  0xe5   : > { %p4389_p13 = scmp.ne.s32.totalorder %s4379_s4, 0 }
  0xe6   : > { %p4390_p7 = scmp.eq.s32.totalorder (!%p4389_p13), %s3894_s30, 0 }
  0xe7   : > { %703 = sbr.rel (%p4389_p13) target bundleno = 2305 (0x901), region = 108 }
  0xee   : > { %3726 = dma.done.wait (%p4390_p7), [#allocation3], 16   ;;  %p4391_p2 = pmov %p4390_p7 }
  0xf0   : > { %3728 = vsyncadd (%p4391_p2), [#allocation3], 4294967280  ;;  %p4392_p3 = pmov %p4391_p2 }
  0xf1   : > { %p4393_p0 = pmov %p4391_p2 }
  0xf2   : > { %3730 = dma.done.wait (%p4392_p3), [#allocation5], 1040  }
  0xf3   : > { %3732 = vsyncadd (%p4393_p0), [#allocation5], 4294966256  ;;  %p4394_p1 = pmov %p4393_p0 }
  0xf4   : > { %p4395_p5 = pmov %p4393_p0 }
  0xf5   : > { %3734 = dma.done.wait (%p4394_p1), [#allocation8], 4112  }
  0xf6   : > { %3736 = vsyncadd (%p4395_p5), [#allocation8], 4294963184  ;;  %p4396_p4 = pmov %p4393_p0 }
  0xf7   : > { %p4397_p6 = pmov %p4393_p0 }
  0xf8   : > { %3738 = dma.done.wait (%p4396_p4), [#allocation11], 8192  }
  0xf9   : > { %3740 = vsyncadd (%p4397_p6), [#allocation11], 4294959104  ;;  %p4398_p8 = pmov %p4393_p0 }
  0xfa   : > { %p4399_p9 = pmov %p4393_p0 }
  0xfb   : > { %3742 = dma.done.wait (%p4398_p8), [#allocation14], 4096  }
  0xfc   : > { %3744 = vsyncadd (%p4399_p9), [#allocation14], 4294963200  ;;  %p795_p10 = scmp.lt.s32.totalorder %s3894_s30, 1  ;;  %v3761_v0 = vmov 2   ;;  %v3762_v1 = vmov 0   ;;  %s4400_s14 = sld [smem:[#allocation21_spill]] }
  0xfd   : > { %3192 = vset.pattern.permute.xlu1 %v3761_v0  ;;  %3190 = vset.pattern.permute.xlu0 %v3762_v1  ;;  %v3763_v3 = vmov 3   ;;  %v3764_v4 = vmov 1   ;;  %v3765_v5 = vmov 4   ;;  %v3766_v6 = vmov 5   ;;  %s4401_s7 = sld [smem:[#allocation25_spill]]  ;;  %v3213_v17 = vld [vmem:[#allocation6] sm:$0xff]  }
  0xfe   : > { %s4409_s30 = smov (!%p795_p10, %s3894_s30), 1  ;;  %v3767_v8 = vmov 6   ;;  %v3768_v11 = vmov 7   ;;  %v3214_v18 = vld [vmem:[#allocation6 + $0x8] sm:$0xff]   ;;  %3065 = vmatprep.subr.bf16.mxu1 %v3213_v17  ;;  %s4402_s26 = sld [smem:[#allocation23_spill]]  ;;  %v3215_v0 = vld [vmem:[#allocation6 + $0x10] sm:$0xff]  }
  0xff   : > { %s4131_s22 = sshll.u32 %s4409_s30, 3  ;;  %3066 = vmatpush3.bf16.msra.mxu1 %v3213_v17  ;;  %v2798_v29 = vld [vmem:[#allocation2] ss:$0 sm:$0xff]  ;;  %s3770_s25 = smov 126  }
 0x100   : > { %3067 = vmatprep.subr.bf16.mxu1 %v3214_v18  ;;  %s3771_s28 = smov 124   ;;  %s3772_s5 = smov 122  }
 0x101   : > { %s4403_s19 = sld [smem:[#allocation22_spill]]  ;;  %s4405_s2 = sld [smem:[#allocation31_spill]] }
 0x102   : > { %s798_s6 = scalar_lea.vmem %s4400_s14, %s4131_s22 }
 0x103   : > { %v4137_v2 = vld [vmem:[%s798_s6] sm:$0xff]  ;;  %v3206_v9 = vld [vmem:[%s4401_s7 + $0x8] sm:$0xff]   ;;  %v3207_v10 = vld [vmem:[%s4401_s7 + $0x10] sm:$0xff]   ;;  %3068 = vmatpush3.bf16.msra.mxu1 %v3214_v18  ;;  %s4404_s6 = sld [smem:[#allocation30_spill]] }
 0x104   : > { %846 = vperm.xlu1 %3192, %v4137_v2   ;;  %815 = vperm.xlu0 %3190, %v4137_v2   ;;  %v3205_v7 = vld [vmem:[%s4401_s7] sm:$0xff]   ;;  %v3208_v12 = vld [vmem:[%s4401_s7 + $0x18] sm:$0xff]   ;;  %v3210_v14 = vld [vmem:[%s4401_s7 + $0x28] sm:$0xff]   ;;  %vm1180_vm4 = vcmp.ne.f32.partialorder %v4137_v2, -1.0 }
 0x105   : > { %3045 = vmatprep.subr.bf16.mxu0 %v3205_v7  ;;  %v3209_v13 = vld [vmem:[%s4401_s7 + $0x20] sm:$0xff]   ;;  %v3211_v15 = vld [vmem:[%s4401_s7 + $0x30] sm:$0xff]   ;;  %v3212_v16 = vld [vmem:[%s4401_s7 + $0x38] sm:$0xff]   ;;  %3069 = vmatprep.subr.bf16.mxu1 %v3215_v0 }
 0x106   : > { %3046 = vmatpush3.bf16.msra.mxu0 %v3205_v7  ;;  %v2796_v21 = vld [vmem:[%s4402_s26] ss:$0 sm:$0xff]  ;;  %v2797_v22 = vld [vmem:[%s4402_s26 + $0x1] ss:$0 sm:$0xff]  ;;  %v3219_v7 = vld [vmem:[#allocation6 + $0x30] sm:$0xff]  }
 0x107   : > { %3047 = vmatprep.subr.bf16.mxu0 %v3206_v9  ;;  %3070 = vmatpush3.bf16.msra.mxu1 %v3215_v0  ;;  %s802_s21 = scalar_lea.vmem %s4403_s19, %s4131_s22  ;;  %v3245_v0 = vld [vmem:[#allocation9] ss:$8 sps:$4 sm:$0xff]  }
 0x108   : > { %3193 = vset.pattern.permute.xlu1 %v3763_v3  ;;  %3191 = vset.pattern.permute.xlu0 %v3764_v4  ;;  %v3216_v3 = vld [vmem:[#allocation6 + $0x18] sm:$0xff]   ;;  %v3769_v4 = vmov 0.0  }
 0x109   : > { %851 = vperm.xlu1 %3193, %v4137_v2   ;;  %824 = vperm.xlu0 %3191, %v4137_v2  }
 0x10a   : > { %3048 = vmatpush3.bf16.msra.mxu0 %v3206_v9  ;;  %3071 = vmatprep.subr.bf16.mxu1 %v3216_v3 }
 0x10b   : > { %3049 = vmatprep.subr.bf16.mxu0 %v3207_v10  ;;  %3072 = vmatpush3.bf16.msra.mxu1 %v3216_v3  ;;  %v3247_v3 = vld [vmem:[#allocation9 + $0x4] ss:$8 sps:$4 sm:$0xff]  }
 0x10d   : > { %3194 = vset.pattern.permute.xlu1 %v3765_v5  ;;  %3195 = vset.pattern.permute.xlu0 %v3766_v6  ;;  %v2829_v5 = vsel %vm1180_vm4, 1.0, %v3769_v4  ;;  %v3217_v6 = vld [vmem:[#allocation6 + $0x20] sm:$0xff]  }
 0x10e   : > { %863 = vperm.xlu1 %3194, %v4137_v2   ;;  %868 = vperm.xlu0 %3195, %v4137_v2  }
 0x10f   : > { %3050 = vmatpush3.bf16.msra.mxu0 %v3207_v10  ;;  %3073 = vmatprep.subr.bf16.mxu1 %v3217_v6 }
 0x110   : > { %3051 = vmatprep.subr.bf16.mxu0 %v3208_v12  ;;  %3074 = vmatpush3.bf16.msra.mxu1 %v3217_v6  ;;  %v3253_v6 = vld [vmem:[#allocation9 + $0x24] ss:$8 sps:$4 sm:$0xff]  }
 0x112   : > { %3196 = vset.pattern.permute.xlu1 %v3767_v8  ;;  %3204 = vset.pattern.permute.xlu0 %v3762_v1  ;;  %v3220_v8 = vld [vmem:[#allocation6 + $0x38] sm:$0xff]  }
 0x113   : > { %880 = vperm.xlu1 %3196, %v4137_v2   ;;  %3052 = vmatpush3.bf16.msra.mxu0 %v3208_v12 }
 0x114   : > { %3053 = vmatprep.subr.bf16.mxu0 %v3209_v13  ;;  %1184 = vrot.lane.b32.xlu0 %v2829_v5, %s3770_s25 }
 0x117   : > { %3197 = vset.pattern.permute.xlu1 %v3768_v11  ;;  %3054 = vmatpush3.bf16.msra.mxu0 %v3209_v13 }
 0x118   : > { %885 = vperm.xlu1 %3197, %v4137_v2   ;;  %3055 = vmatprep.subr.bf16.mxu0 %v3210_v14 }
 0x119   : > { %1192 = vrot.lane.b32.xlu0 %v2829_v5, %s3772_s5 }
 0x11b   : > { %3056 = vmatpush3.bf16.msra.mxu0 %v3210_v14  ;;  %v2803_v14 = vld [vmem:[#allocation4] ss:$0 sm:$0xff] }
 0x11c   : > { %3198 = vset.pattern.permute.xlu1 %v3762_v1  ;;  %3057 = vmatprep.subr.bf16.mxu0 %v3211_v15 }
 0x11d   : > { %1188 = vrot.lane.b32.xlu1 %v2829_v5, %s3771_s28  ;;  %s4406_s28 = sld [smem:[#allocation32_spill]] }
 0x11f   : > { %3058 = vmatpush3.bf16.msra.mxu0 %v3211_v15 }
 0x120   : > { %3059 = vmatprep.subr.bf16.mxu0 %v3212_v16 }
 0x123   : > { %3060 = vmatpush3.bf16.msra.mxu0 %v3212_v16  ;;  %s806_s5 = scalar_lea.vmem %s4406_s28, %s4131_s22 }
 0x183   : > { %v847_v19 = vpop.permute.xlu1 %846  ;;  %v816_v20 = vpop.permute.xlu0 %815 }
 0x184   : > { %v822_v23 = vmul.f32 %v2796_v21, %v816_v20  ;;  %v849_v26 = vmul.f32 %v2796_v21, %v847_v19 }
 0x188   : > { %v852_v24 = vpop.permute.xlu1 %851  ;;  %v825_v25 = vpop.permute.xlu0 %824 }
 0x189   : > { %v854_v27 = vmul.f32 %v2797_v22, %v852_v24  ;;  %v831_v28 = vmul.f32 %v2797_v22, %v825_v25 }
 0x18b   : > { %v855_v30 = vadd.f32 %v854_v27, %v849_v26  ;;  %v832_v31 = vadd.f32 %v831_v28, %v822_v23 }
 0x18d   : > { %v856_v32 = vadd.f32 %v2798_v29, %v855_v30  ;;  %v839_v33 = vadd.f32 %v2798_v29, %v832_v31  ;;  %v864_v34 = vpop.permute.xlu1 %863  ;;  %v869_v35 = vpop.permute.xlu0 %868  ;;  %v809_v31 = vld [vmem:[%s802_s21] sm:$0xff] }
 0x18e   : > { %v866_v36 = vmul.f32 %v2796_v21, %v864_v34  ;;  %v871_v37 = vmul.f32 %v2797_v22, %v869_v35 }
 0x18f   : > { %v841_v38 = vmul.f32 1.442695, %v839_v33  ;;  %v858_v39 = vmul.f32 1.442695, %v856_v32  ;;  %vm840_vm0 = vcmp.gt.f32.partialorder %v839_v33, 0.0  ;;  %vm857_vm1 = vcmp.gt.f32.partialorder %v856_v32, 0.0 }
 0x190   : > { %v872_v40 = vadd.f32 %v871_v37, %v866_v36 }
 0x191   : > { %3453 = vpow2.f32 %v841_v38  ;;  %v1185_v2 = vpop.permute.xlu0 %1184 }
 0x192   : > { %v881_v41 = vpop.permute.xlu1 %880  ;;  %3455 = vpow2.f32 %v858_v39  ;;  %v873_v42 = vadd.f32 %v2798_v29, %v872_v40  ;;  %v1187_v9 = vadd.f32 %v2829_v5, %v1185_v2  ;;  %v3248_v5 = vld [vmem:[#allocation9 + $0x10] ss:$8 sps:$4 sm:$0xff]   ;;  %v3259_v2 = vld [vmem:[#allocation9 + $0x44] ss:$8 sps:$4 sm:$0xff]  }
 0x193   : > { %v883_v45 = vmul.f32 %v2796_v21, %v881_v41 }
 0x194   : > { %v875_v44 = vmul.f32 1.442695, %v873_v42  ;;  %vm874_vm2 = vcmp.gt.f32.partialorder %v873_v42, 0.0 }
 0x195   : > { %v1193_v12 = vpop.permute.xlu0 %1192 }
 0x196   : > { %3457 = vpow2.f32 %v875_v44 }
 0x197   : > { %v886_v43 = vpop.permute.xlu1 %885 }
 0x198   : > { %v888_v46 = vmul.f32 %v2797_v22, %v886_v43 }
 0x19a   : > { %v889_v47 = vadd.f32 %v888_v46, %v883_v45 }
 0x19b   : > { %v3454_v48 = vpop.eup %3453  ;;  %v1189_v10 = vpop.permute.xlu1 %1188 }
 0x19c   : > { %v3456_v49 = vpop.eup %3455  ;;  %v890_v50 = vadd.f32 %v2798_v29, %v889_v47  ;;  %v2799_v51 = vadd.f32 -1.0, %v3454_v48  ;;  %v1191_v11 = vadd.f32 %v1189_v10, %v1187_v9  ;;  %v3223_v48 = vld [vmem:[%s4338_s8 + $0x4] ss:$8 sps:$4 sm:$0xff]   ;;  %v3257_v9 = vld [vmem:[#allocation9 + $0x40] ss:$8 sps:$4 sm:$0xff]  }
 0x19d   : > { %v2800_v52 = vadd.f32 -1.0, %v3456_v49  ;;  %v3221_v49 = vld [vmem:[%s4338_s8] ss:$8 sps:$4 sm:$0xff]   ;;  %1335 = vmatprep.subr.bf16.mxu0 %v3223_v48 }
 0x19e   : > { %v892_v53 = vmul.f32 1.442695, %v890_v50  ;;  %v844_v54 = vsel %vm840_vm0, %v839_v33, %v2799_v51  ;;  %vm891_vm3 = vcmp.gt.f32.partialorder %v890_v50, 0.0  ;;  %v1195_v13 = vadd.f32 %v1193_v12, %v1191_v11  ;;  %v3224_v51 = vld [vmem:[%s4338_s8 + $0x10] ss:$8 sps:$4 sm:$0xff]  }
 0x19f   : > { %v861_v55 = vsel %vm857_vm1, %v856_v32, %v2800_v52  ;;  %v3229_v52 = vld [vmem:[%s4338_s8 + $0x24] ss:$8 sps:$4 sm:$0xff]  }
 0x1a0   : > { %3459 = vpow2.f32 %v892_v53  ;;  %v896_v56 = vpack.c.bf16 %v861_v55, %v844_v54  ;;  %v3458_v57 = vpop.eup %3457  ;;  %vm1196_vm5 = vcmp.eq.f32.partialorder %v1195_v13, 4.0  ;;  %vm1198_vm6 = vcmp.eq.f32.partialorder %v1195_v13, 2.0  ;;  %v3227_v53 = vld [vmem:[%s4338_s8 + $0x20] ss:$8 sps:$4 sm:$0xff]   ;;  %v3232_v54 = vld [vmem:[%s4338_s8 + $0x34] ss:$8 sps:$4 sm:$0xff]  }
 0x1a1   : > { %v2801_v58 = vadd.f32 -1.0, %v3458_v57  ;;  %v1197_v16 = vsel %vm1196_vm5, 0.25, %v3769_v4  ;;  %v1199_v17 = vsel %vm1198_vm6, 0.5, %v3769_v4  ;;  %v3230_v55 = vld [vmem:[%s4338_s8 + $0x30] ss:$8 sps:$4 sm:$0xff]  }
 0x1a2   : > { %3061 = vmatprep.mubr.bf16.mxu0 %v896_v56  ;;  %v1216_v20 = vmul.f32 4.0, %v1197_v16  ;;  %v1217_v21 = vmul.f32 2.0, %v1199_v17  ;;  %v3199_v22 = vpack.i.bf16 %v1199_v17, %v1197_v16  ;;  %v3235_v56 = vld [vmem:[%s4338_s8 + $0x44] ss:$8 sps:$4 sm:$0xff]   ;;  %v3233_v57 = vld [vmem:[%s4338_s8 + $0x40] ss:$8 sps:$4 sm:$0xff]  }
 0x1a3   : > { %v878_v61 = vsel %vm874_vm2, %v873_v42, %v2801_v58  ;;  %v3238_v58 = vld [vmem:[%s4338_s8 + $0x54] ss:$8 sps:$4 sm:$0xff]   ;;  %v3260_v11 = vld [vmem:[#allocation9 + $0x50] ss:$8 sps:$4 sm:$0xff]  }
 0x1a4   : > { %3200 = vperm.xlu1 %3198, %v3199_v22   ;;  %v1218_v28 = vadd.f32 %v1217_v21, %v1216_v20  ;;  %v3250_v4 = vld [vmem:[#allocation9 + $0x14] ss:$8 sps:$4 sm:$0xff]   ;;  %v3265_v12 = vld [vmem:[#allocation9 + $0x64] ss:$8 sps:$4 sm:$0xff]   ;;  %v3263_v13 = vld [vmem:[#allocation9 + $0x60] ss:$8 sps:$4 sm:$0xff]  }
 0x1a5   : > { %v3262_v10 = vld [vmem:[#allocation9 + $0x54] ss:$8 sps:$4 sm:$0xff]   ;;  %v3271_v16 = vld [vmem:[#allocation9 + $0x84] ss:$8 sps:$4 sm:$0xff]   ;;  %v3269_v17 = vld [vmem:[#allocation9 + $0x80] ss:$8 sps:$4 sm:$0xff]  }
 0x1a6   : > { %1239 = vperm.xlu0 %3204, %v1218_v28   ;;  %v2816_v20 = vld [vmem:[#allocation7] ss:$0 sm:$0xff] }
 0x1a8   : > { %1379 = vperm.xlu1 %3198, %v809_v31  }
 0x1aa   : > { %v3460_v59 = vpop.eup %3459 }
 0x1ab   : > { %v2802_v60 = vadd.f32 -1.0, %v3460_v59  ;;  %v3236_v59 = vld [vmem:[%s4338_s8 + $0x50] ss:$8 sps:$4 sm:$0xff]  }
 0x1ad   : > { %v895_v62 = vsel %vm891_vm3, %v890_v50, %v2802_v60  ;;  %v3226_v50 = vld [vmem:[%s4338_s8 + $0x14] ss:$8 sps:$4 sm:$0xff]   ;;  %v3241_v60 = vld [vmem:[%s4338_s8 + $0x64] ss:$8 sps:$4 sm:$0xff]  }
 0x1ae   : > { %v897_v63 = vpack.c.bf16 %v895_v62, %v878_v61  ;;  %v3239_v61 = vld [vmem:[%s4338_s8 + $0x60] ss:$8 sps:$4 sm:$0xff]   ;;  %v3244_v62 = vld [vmem:[%s4338_s8 + $0x74] ss:$8 sps:$4 sm:$0xff]  }
 0x1b0   : > { %3062 = vmatmul.mubr.bf16.vlgmr.msra.gmra.mrb[0].mxu0 %v897_v63  ;;  %v3242_v63 = vld [vmem:[%s4338_s8 + $0x70] ss:$8 sps:$4 sm:$0xff]  }
 0x1b1   : > { %1367 = vmatprep.mubr.bf16.mxu0 %v3762_v1  ;;  %v3218_v1 = vld [vmem:[#allocation6 + $0x28] sm:$0xff]   ;;  %1336 = vmatpush1.bf16.msra.mxu0 %v3221_v49 }
 0x1b2   : > { %3075 = vmatprep.subr.bf16.mxu1 %v3218_v1  ;;  %1337 = vmatprep.subr.bf16.mxu0 %v3226_v50 }
 0x1b3   : > { %3076 = vmatpush3.bf16.msra.mxu1 %v3218_v1  ;;  %v3251_v1 = vld [vmem:[#allocation9 + $0x20] ss:$8 sps:$4 sm:$0xff]  }
 0x1b4   : > { %3077 = vmatprep.subr.bf16.mxu1 %v3219_v7 }
 0x1b5   : > { %1338 = vmatpush1.bf16.msra.mxu0 %v3224_v51 }
 0x1b6   : > { %1339 = vmatprep.subr.bf16.mxu0 %v3229_v52 }
 0x1b7   : > { %3078 = vmatpush3.bf16.msra.mxu1 %v3219_v7  ;;  %v3256_v7 = vld [vmem:[#allocation9 + $0x34] ss:$8 sps:$4 sm:$0xff]  }
 0x1b8   : > { %3079 = vmatprep.subr.bf16.mxu1 %v3220_v8 }
 0x1b9   : > { %1340 = vmatpush1.bf16.msra.mxu0 %v3227_v53 }
 0x1ba   : > { %1341 = vmatprep.subr.bf16.mxu0 %v3232_v54 }
 0x1bb   : > { %3080 = vmatpush3.bf16.msra.mxu1 %v3220_v8  ;;  %v3254_v8 = vld [vmem:[#allocation9 + $0x30] ss:$8 sps:$4 sm:$0xff]  }
 0x1bc   : > { %1627 = vmatprep.subr.bf16.mxu1 %v3247_v3  ;;  %v3292_v3 = vld [vmem:[#allocation9 + $0xf4] ss:$8 sps:$4 sm:$0xff]  }
 0x1bd   : > { %1342 = vmatpush1.bf16.msra.mxu0 %v3230_v55  ;;  %v3277_v55 = vld [vmem:[#allocation9 + $0xa4] ss:$8 sps:$4 sm:$0xff]  }
 0x1be   : > { %1343 = vmatprep.subr.bf16.mxu0 %v3235_v56  ;;  %v3275_v56 = vld [vmem:[#allocation9 + $0xa0] ss:$8 sps:$4 sm:$0xff]  }
 0x1c1   : > { %1344 = vmatpush1.bf16.msra.mxu0 %v3233_v57  ;;  %v3280_v57 = vld [vmem:[#allocation9 + $0xb4] ss:$8 sps:$4 sm:$0xff]  }
 0x1c2   : > { %1345 = vmatprep.subr.bf16.mxu0 %v3238_v58  ;;  %v3278_v58 = vld [vmem:[#allocation9 + $0xb0] ss:$8 sps:$4 sm:$0xff]  }
 0x1c5   : > { %1346 = vmatpush1.bf16.msra.mxu0 %v3236_v59  ;;  %v3281_v59 = vld [vmem:[#allocation9 + $0xc0] ss:$8 sps:$4 sm:$0xff]  }
 0x1c6   : > { %1347 = vmatprep.subr.bf16.mxu0 %v3241_v60  ;;  %v3283_v60 = vld [vmem:[#allocation9 + $0xc4] ss:$8 sps:$4 sm:$0xff]  }
 0x1c9   : > { %1348 = vmatpush1.bf16.msra.mxu0 %v3239_v61  ;;  %v3286_v61 = vld [vmem:[#allocation9 + $0xd4] ss:$8 sps:$4 sm:$0xff]  }
 0x1ca   : > { %1349 = vmatprep.subr.bf16.mxu0 %v3244_v62  ;;  %v3284_v62 = vld [vmem:[#allocation9 + $0xd0] ss:$8 sps:$4 sm:$0xff]  }
 0x1cd   : > { %1350 = vmatpush1.bf16.msra.mxu0 %v3242_v63  ;;  %v3289_v63 = vld [vmem:[#allocation9 + $0xe4] ss:$8 sps:$4 sm:$0xff]  }
 0x283   : > { %v3063_v15 = vpop.f32.mrb[0].mxu0 }
 0x284   : > { %v1012_v18 = vadd.f32 %v3063_v15, %v2803_v14  ;;  %v1003_v19 = vpop.f32.mrb[1].mxu0  ;;  %v3266_v15 = vld [vmem:[#allocation9 + $0x70] ss:$8 sps:$4 sm:$0xff]  }
 0x285   : > { %v1004_v23 = vadd.f32 %v2803_v14, %v1003_v19  ;;  %v3064_v24 = vpop.f32.mrb[2].mxu0  ;;  %v3272_v19 = vld [vmem:[#allocation9 + $0x90] ss:$8 sps:$4 sm:$0xff]  }
 0x286   : > { %v1026_v25 = vmul.f32 1.442695, %v1012_v18  ;;  %v1015_v26 = vadd.f32 %v3064_v24, %v2803_v14  ;;  %v1006_v27 = vpop.f32.mrb[3].mxu0  ;;  %vm1020_vm7 = vcmp.gt.f32.partialorder %v1012_v18, 0.0 }
 0x287   : > { %v1022_v29 = vmul.f32 1.442695, %v1004_v23  ;;  %v1007_v30 = vadd.f32 %v2803_v14, %v1006_v27  ;;  %vm1018_vm9 = vcmp.gt.f32.partialorder %v1004_v23, 0.0  ;;  %v3268_v14 = vld [vmem:[#allocation9 + $0x74] ss:$8 sps:$4 sm:$0xff]  }
 0x288   : > { %3461 = vpow2.f32 %v1026_v25  ;;  %v1028_v32 = vmul.f32 1.442695, %v1015_v26  ;;  %vm1021_vm8 = vcmp.gt.f32.partialorder %v1015_v26, 0.0 }
 0x289   : > { %3463 = vpow2.f32 %v1022_v29  ;;  %v1024_v33 = vmul.f32 1.442695, %v1007_v30  ;;  %vm1019_vm10 = vcmp.gt.f32.partialorder %v1007_v30, 0.0 }
 0x28a   : > { %3465 = vpow2.f32 %v1028_v32 }
 0x28b   : > { %3467 = vpow2.f32 %v1024_v33 }
 0x292   : > { %v3462_v34 = vpop.eup %3461 }
 0x293   : > { %v3464_v35 = vpop.eup %3463  ;;  %v2814_v36 = vadd.f32 -1.0, %v3462_v34 }
 0x294   : > { %v3466_v37 = vpop.eup %3465  ;;  %v2812_v38 = vadd.f32 -1.0, %v3464_v35 }
 0x295   : > { %v3468_v39 = vpop.eup %3467  ;;  %v2815_v40 = vadd.f32 -1.0, %v3466_v37  ;;  %v1036_v42 = vsel %vm1020_vm7, %v1012_v18, %v2814_v36  ;;  %v3274_v18 = vld [vmem:[#allocation9 + $0x94] ss:$8 sps:$4 sm:$0xff]  }
 0x296   : > { %v2813_v41 = vadd.f32 -1.0, %v3468_v39  ;;  %v1034_v44 = vsel %vm1018_vm9, %v1004_v23, %v2812_v38  ;;  %vm2626_vm9 = vcmask 15360  }
 0x297   : > { %v1037_v43 = vsel %vm1021_vm8, %v1015_v26, %v2815_v40 }
 0x298   : > { %v1035_v45 = vsel %vm1019_vm10, %v1007_v30, %v2813_v41  ;;  %v1039_v46 = vpack.c.bf16 %v1037_v43, %v1036_v42  ;;  %v3201_v43 = vpop.permute.xlu1 %3200 }
 0x299   : > { %v1038_v47 = vpack.c.bf16 %v1035_v45, %v1034_v44  ;;  %v3202_v48 = vunpack.i.l.bf16 %v3201_v43 }
 0x29b   : > { %3081 = vmatprep.mubr.bf16.mxu1 %v1038_v47  ;;  %v3203_v47 = vunpack.i.h.bf16 %v3201_v43 }
 0x29c   : > { %3082 = vmatmul.mubr.bf16.vlgmr.msra.gmra.mrb[0].mxu1 %v1039_v46 }
 0x29d   : > { %1628 = vmatpush1.bf16.msra.mxu1 %v3245_v0  ;;  %v3287_v0 = vld [vmem:[#allocation9 + $0xe0] ss:$8 sps:$4 sm:$0xff]  }
 0x29e   : > { %1629 = vmatprep.subr.bf16.mxu1 %v3250_v4  ;;  %v3290_v4 = vld [vmem:[#allocation9 + $0xf0] ss:$8 sps:$4 sm:$0xff]  }
 0x2a1   : > { %1630 = vmatpush1.bf16.msra.mxu1 %v3248_v5  ;;  %v3293_v5 = vld [vmem:[#allocation10] ss:$8 sps:$4 sm:$0xff]  }
 0x2a2   : > { %1631 = vmatprep.subr.bf16.mxu1 %v3253_v6  ;;  %v3295_v6 = vld [vmem:[#allocation10 + $0x4] ss:$8 sps:$4 sm:$0xff]  }
 0x2a3   : > { %1884 = vmatprep.subr.bf16.mxu0 %v3295_v6  ;;  %v3334_v6 = vld [vmem:[#allocation10 + $0xd4] ss:$8 sps:$4 sm:$0xff]  }
 0x2a5   : > { %1632 = vmatpush1.bf16.msra.mxu1 %v3251_v1  ;;  %v3298_v1 = vld [vmem:[#allocation10 + $0x14] ss:$8 sps:$4 sm:$0xff]  }
 0x2a6   : > { %1633 = vmatprep.subr.bf16.mxu1 %v3256_v7  ;;  %v3296_v7 = vld [vmem:[#allocation10 + $0x10] ss:$8 sps:$4 sm:$0xff]  }
 0x2a9   : > { %1634 = vmatpush1.bf16.msra.mxu1 %v3254_v8  ;;  %v3301_v8 = vld [vmem:[#allocation10 + $0x24] ss:$8 sps:$4 sm:$0xff]  }
 0x2aa   : > { %1635 = vmatprep.subr.bf16.mxu1 %v3259_v2  ;;  %v3299_v2 = vld [vmem:[#allocation10 + $0x20] ss:$8 sps:$4 sm:$0xff]  }
 0x2ad   : > { %1636 = vmatpush1.bf16.msra.mxu1 %v3257_v9  ;;  %v3304_v9 = vld [vmem:[#allocation10 + $0x34] ss:$8 sps:$4 sm:$0xff]  }
 0x2ae   : > { %1637 = vmatprep.subr.bf16.mxu1 %v3262_v10  ;;  %v3302_v10 = vld [vmem:[#allocation10 + $0x30] ss:$8 sps:$4 sm:$0xff]  }
 0x2b1   : > { %1638 = vmatpush1.bf16.msra.mxu1 %v3260_v11  ;;  %v3307_v11 = vld [vmem:[#allocation10 + $0x44] ss:$8 sps:$4 sm:$0xff]  }
 0x2b2   : > { %1639 = vmatprep.subr.bf16.mxu1 %v3265_v12  ;;  %v3305_v12 = vld [vmem:[#allocation10 + $0x40] ss:$8 sps:$4 sm:$0xff]  }
 0x2b5   : > { %1640 = vmatpush1.bf16.msra.mxu1 %v3263_v13  ;;  %v3310_v13 = vld [vmem:[#allocation10 + $0x54] ss:$8 sps:$4 sm:$0xff]  }
 0x2b6   : > { %1641 = vmatprep.subr.bf16.mxu1 %v3268_v14  ;;  %v3308_v14 = vld [vmem:[#allocation10 + $0x50] ss:$8 sps:$4 sm:$0xff]  }
 0x2b9   : > { %1642 = vmatpush1.bf16.msra.mxu1 %v3266_v15  ;;  %v3313_v15 = vld [vmem:[#allocation10 + $0x64] ss:$8 sps:$4 sm:$0xff]  }
 0x2ba   : > { %1643 = vmatprep.subr.bf16.mxu1 %v3271_v16  ;;  %v3311_v16 = vld [vmem:[#allocation10 + $0x60] ss:$8 sps:$4 sm:$0xff]  }
 0x2bd   : > { %1644 = vmatpush1.bf16.msra.mxu1 %v3269_v17  ;;  %v3316_v17 = vld [vmem:[#allocation10 + $0x74] ss:$8 sps:$4 sm:$0xff]  }
 0x2be   : > { %1645 = vmatprep.subr.bf16.mxu1 %v3274_v18  ;;  %v3314_v18 = vld [vmem:[#allocation10 + $0x70] ss:$8 sps:$4 sm:$0xff]  }
 0x2c1   : > { %1646 = vmatpush1.bf16.msra.mxu1 %v3272_v19  ;;  %v3319_v19 = vld [vmem:[#allocation10 + $0x84] ss:$8 sps:$4 sm:$0xff]  }
 0x2c2   : > { %1647 = vmatprep.subr.bf16.mxu1 %v3277_v55 }
 0x2c5   : > { %1648 = vmatpush1.bf16.msra.mxu1 %v3275_v56 }
 0x2c6   : > { %1649 = vmatprep.subr.bf16.mxu1 %v3280_v57 }
 0x2c9   : > { %1650 = vmatpush1.bf16.msra.mxu1 %v3278_v58 }
 0x2ca   : > { %1651 = vmatprep.subr.bf16.mxu1 %v3283_v60 }
 0x2cd   : > { %1652 = vmatpush1.bf16.msra.mxu1 %v3281_v59 }
 0x2ce   : > { %1653 = vmatprep.subr.bf16.mxu1 %v3286_v61 }
 0x2d1   : > { %1654 = vmatpush1.bf16.msra.mxu1 %v3284_v62 }
 0x2d2   : > { %1655 = vmatprep.subr.bf16.mxu1 %v3289_v63 }
 0x2d5   : > { %1656 = vmatpush1.bf16.msra.mxu1 %v3287_v0  ;;  %v3328_v0 = vld [vmem:[#allocation10 + $0xb4] ss:$8 sps:$4 sm:$0xff]  }
 0x2d6   : > { %1657 = vmatprep.subr.bf16.mxu1 %v3292_v3  ;;  %v3326_v3 = vld [vmem:[#allocation10 + $0xb0] ss:$8 sps:$4 sm:$0xff]  }
 0x2d9   : > { %1658 = vmatpush1.bf16.msra.mxu1 %v3290_v4  ;;  %v3331_v4 = vld [vmem:[#allocation10 + $0xc4] ss:$8 sps:$4 sm:$0xff]  }
 0x36f   : > { %v3083_v21 = vpop.f32.mrb[0].mxu1 }
 0x370   : > { %v1154_v22 = vadd.f32 %v3083_v21, %v2816_v20  ;;  %v1145_v23 = vpop.f32.mrb[1].mxu1  ;;  %v3322_v21 = vld [vmem:[#allocation10 + $0x94] ss:$8 sps:$4 sm:$0xff]  }
 0x371   : > { %v1146_v24 = vadd.f32 %v2816_v20, %v1145_v23  ;;  %v3084_v25 = vpop.f32.mrb[2].mxu1  ;;  %v3325_v23 = vld [vmem:[#allocation10 + $0xa4] ss:$8 sps:$4 sm:$0xff]  }
 0x372   : > { %v1168_v26 = vmul.f32 1.442695, %v1154_v22  ;;  %v1157_v27 = vadd.f32 %v3084_v25, %v2816_v20  ;;  %v1148_v28 = vpop.f32.mrb[3].mxu1  ;;  %vm1162_vm13 = vcmp.gt.f32.partialorder %v1154_v22, 0.0  ;;  %v1243_v25 = vlaneseq }
 0x373   : > { %v1164_v29 = vmul.f32 1.442695, %v1146_v24  ;;  %v1149_v30 = vadd.f32 %v2816_v20, %v1148_v28  ;;  %vm1160_vm11 = vcmp.gt.f32.partialorder %v1146_v24, 0.0  ;;  %v3317_v20 = vld [vmem:[#allocation10 + $0x80] ss:$8 sps:$4 sm:$0xff]  }
 0x374   : > { %3469 = vpow2.f32 %v1168_v26  ;;  %v1170_v31 = vmul.f32 1.442695, %v1157_v27  ;;  %vm1163_vm14 = vcmp.gt.f32.partialorder %v1157_v27, 0.0  ;;  %v1244_v26 = vshrl.u32 %v1243_v25, 7  ;;  %v3362_v25 = vld [vmem:[#allocation12 + $0x70] ss:$8 sps:$4 sm:$0xff]  }
 0x375   : > { %3471 = vpow2.f32 %v1164_v29  ;;  %v1166_v32 = vmul.f32 1.442695, %v1149_v30  ;;  %vm1161_vm12 = vcmp.gt.f32.partialorder %v1149_v30, 0.0 }
 0x376   : > { %3473 = vpow2.f32 %v1170_v31  ;;  %v4236_v28 = vsub.s32 0, %v1244_v26  ;;  %v4238_v29 = vsub.s32 1, %v1244_v26  ;;  %v3367_v26 = vld [vmem:[#allocation12 + $0x84] ss:$8 sps:$4 sm:$0xff]  }
 0x377   : > { %3475 = vpow2.f32 %v1166_v32 }
 0x37e   : > { %v3470_v33 = vpop.eup %3469 }
 0x37f   : > { %v3472_v34 = vpop.eup %3471  ;;  %v2827_v38 = vadd.f32 -1.0, %v3470_v33  ;;  %v1240_v33 = vpop.permute.xlu0 %1239 }
 0x380   : > { %v3474_v35 = vpop.eup %3473  ;;  %v2825_v36 = vadd.f32 -1.0, %v3472_v34 }
 0x381   : > { %v3476_v37 = vpop.eup %3475  ;;  %v2828_v41 = vadd.f32 -1.0, %v3474_v35  ;;  %v1178_v45 = vsel %vm1162_vm13, %v1154_v22, %v2827_v38  ;;  %v3320_v22 = vld [vmem:[#allocation10 + $0x90] ss:$8 sps:$4 sm:$0xff]  }
 0x382   : > { %v2826_v39 = vadd.f32 -1.0, %v3476_v37  ;;  %v1176_v40 = vsel %vm1160_vm11, %v1146_v24, %v2825_v36  ;;  %v3323_v24 = vld [vmem:[#allocation10 + $0xa0] ss:$8 sps:$4 sm:$0xff]   ;;  %v1380_v36 = vpop.permute.xlu1 %1379 }
 0x383   : > { %v1179_v49 = vsel %vm1163_vm14, %v1157_v27, %v2828_v41  ;;  %v1236_v27 = vld [vmem:[%s4339_s9] sm:$0x3] }
 0x384   : > { %v1177_v42 = vsel %vm1161_vm12, %v1149_v30, %v2826_v39  ;;  %v1376_v30 = vld [vmem:[%s4340_s10] sm:$0x3]  ;;  %v1246_v31 = vrot.slane %v1236_v27, %v4236_v28  ;;  %v1250_v32 = vrot.slane %v1236_v27, %v4238_v29 }
 0x385   : > { %v1200_v44 = vadd.f32 %v1177_v42, %v1176_v40  ;;  %v1386_v34 = vrot.slane %v1376_v30, %v4236_v28  ;;  %v1390_v35 = vrot.slane %v1376_v30, %v4238_v29  ;;  %v1397_v37 = vld [vmem:[%s4341_s11] sm:$0x3]  ;;  %v3370_v30 = vld [vmem:[#allocation12 + $0x94] ss:$8 sps:$4 sm:$0xff]  }
 0x386   : > { %v1253_v38 = vmul.f32 %v1246_v31, %v1240_v33  ;;  %v1254_v39 = vmul.f32 %v1250_v32, %v1240_v33  ;;  %v1402_v43 = vrot.slane %v1397_v37, %v4236_v28  ;;  %v3365_v27 = vld [vmem:[#allocation12 + $0x80] ss:$8 sps:$4 sm:$0xff]   ;;  %v3368_v31 = vld [vmem:[#allocation12 + $0x90] ss:$8 sps:$4 sm:$0xff]   ;;  %v3373_v32 = vld [vmem:[#allocation12 + $0xa4] ss:$8 sps:$4 sm:$0xff]  }
 0x387   : > { %v1201_v46 = vadd.f32 %v1200_v44, %v1178_v45  ;;  %v1214_v51 = vmul.f32 %v3203_v47, %v1200_v44  ;;  %v1393_v41 = vmul.f32 %v1386_v34, %v1380_v36  ;;  %v1394_v45 = vmul.f32 %v1390_v35, %v1380_v36  ;;  %v3371_v33 = vld [vmem:[#allocation12 + $0xa0] ss:$8 sps:$4 sm:$0xff]  }
 0x388   : > { %v1406_v47 = vrot.slane %v1397_v37, %v4238_v29  ;;  %v1455_v34 = vld [vmem:[%s4343_s13] sm:$0x3] }
 0x389   : > { %v1202_v50 = vadd.f32 %v1201_v46, %v1179_v49  ;;  %v1460_v35 = vrot.slane %v1455_v34, %v4236_v28  ;;  %v1464_v36 = vrot.slane %v1455_v34, %v4238_v29 }
 0x38b   : > { %v1208_v52 = vmul.f32 %v3202_v48, %v1202_v50 }
 0x38d   : > { %v1215_v53 = vadd.f32 %v1214_v51, %v1208_v52 }
 0x38f   : > { %v1219_v54 = vpack.c.bf16 %v1215_v53, %v1215_v53 }
 0x391   : > { %1368 = vmatmul.mubr.bf16.vlgmr.msra.gmra.mrb[4].mxu0 %v1219_v54 }
 0x392   : > { %1885 = vmatpush1.bf16.msra.mxu0 %v3293_v5  ;;  %v3329_v5 = vld [vmem:[#allocation10 + $0xc0] ss:$8 sps:$4 sm:$0xff]  }
 0x393   : > { %1886 = vmatprep.subr.bf16.mxu0 %v3298_v1  ;;  %v3332_v1 = vld [vmem:[#allocation10 + $0xd0] ss:$8 sps:$4 sm:$0xff]  }
 0x396   : > { %1887 = vmatpush1.bf16.msra.mxu0 %v3296_v7  ;;  %v3337_v7 = vld [vmem:[#allocation10 + $0xe4] ss:$8 sps:$4 sm:$0xff]  }
 0x397   : > { %1888 = vmatprep.subr.bf16.mxu0 %v3301_v8  ;;  %v3335_v8 = vld [vmem:[#allocation10 + $0xe0] ss:$8 sps:$4 sm:$0xff]  }
 0x39a   : > { %1889 = vmatpush1.bf16.msra.mxu0 %v3299_v2  ;;  %v3340_v2 = vld [vmem:[#allocation10 + $0xf4] ss:$8 sps:$4 sm:$0xff]  }
 0x39b   : > { %1890 = vmatprep.subr.bf16.mxu0 %v3304_v9  ;;  %v3338_v9 = vld [vmem:[#allocation10 + $0xf0] ss:$8 sps:$4 sm:$0xff]  }
 0x39e   : > { %1891 = vmatpush1.bf16.msra.mxu0 %v3302_v10  ;;  %v3341_v10 = vld [vmem:[#allocation12] ss:$8 sps:$4 sm:$0xff]  }
 0x39f   : > { %1892 = vmatprep.subr.bf16.mxu0 %v3307_v11  ;;  %v3343_v11 = vld [vmem:[#allocation12 + $0x4] ss:$8 sps:$4 sm:$0xff]  }
 0x3a0   : > { %2141 = vmatprep.subr.bf16.mxu1 %v3343_v11  ;;  %v3409_v11 = vld [vmem:[#allocation13 + $0x64] ss:$8 sps:$4 sm:$0xff]  }
 0x3a2   : > { %1893 = vmatpush1.bf16.msra.mxu0 %v3305_v12  ;;  %v3346_v12 = vld [vmem:[#allocation12 + $0x14] ss:$8 sps:$4 sm:$0xff]  }
 0x3a3   : > { %1894 = vmatprep.subr.bf16.mxu0 %v3310_v13  ;;  %v3344_v13 = vld [vmem:[#allocation12 + $0x10] ss:$8 sps:$4 sm:$0xff]  }
 0x3a6   : > { %1895 = vmatpush1.bf16.msra.mxu0 %v3308_v14  ;;  %v3349_v14 = vld [vmem:[#allocation12 + $0x24] ss:$8 sps:$4 sm:$0xff]  }
 0x3a7   : > { %1896 = vmatprep.subr.bf16.mxu0 %v3313_v15  ;;  %v3347_v15 = vld [vmem:[#allocation12 + $0x20] ss:$8 sps:$4 sm:$0xff]  }
 0x3aa   : > { %1897 = vmatpush1.bf16.msra.mxu0 %v3311_v16  ;;  %v3352_v16 = vld [vmem:[#allocation12 + $0x34] ss:$8 sps:$4 sm:$0xff]  }
 0x3ab   : > { %1898 = vmatprep.subr.bf16.mxu0 %v3316_v17  ;;  %v3350_v17 = vld [vmem:[#allocation12 + $0x30] ss:$8 sps:$4 sm:$0xff]  }
 0x3ae   : > { %1899 = vmatpush1.bf16.msra.mxu0 %v3314_v18  ;;  %v3355_v18 = vld [vmem:[#allocation12 + $0x44] ss:$8 sps:$4 sm:$0xff]  }
 0x3af   : > { %1900 = vmatprep.subr.bf16.mxu0 %v3319_v19  ;;  %v3353_v19 = vld [vmem:[#allocation12 + $0x40] ss:$8 sps:$4 sm:$0xff]  }
 0x3b2   : > { %1901 = vmatpush1.bf16.msra.mxu0 %v3317_v20  ;;  %v3358_v20 = vld [vmem:[#allocation12 + $0x54] ss:$8 sps:$4 sm:$0xff]  }
 0x3b3   : > { %1902 = vmatprep.subr.bf16.mxu0 %v3322_v21  ;;  %v3356_v21 = vld [vmem:[#allocation12 + $0x50] ss:$8 sps:$4 sm:$0xff]  }
 0x3b6   : > { %1903 = vmatpush1.bf16.msra.mxu0 %v3320_v22  ;;  %v3361_v22 = vld [vmem:[#allocation12 + $0x64] ss:$8 sps:$4 sm:$0xff]  }
 0x3b7   : > { %1904 = vmatprep.subr.bf16.mxu0 %v3325_v23  ;;  %v3359_v23 = vld [vmem:[#allocation12 + $0x60] ss:$8 sps:$4 sm:$0xff]  }
 0x3ba   : > { %1905 = vmatpush1.bf16.msra.mxu0 %v3323_v24  ;;  %v3364_v24 = vld [vmem:[#allocation12 + $0x74] ss:$8 sps:$4 sm:$0xff]  }
 0x3bb   : > { %1906 = vmatprep.subr.bf16.mxu0 %v3328_v0  ;;  %v3391_v0 = vld [vmem:[#allocation13 + $0x4] ss:$8 sps:$4 sm:$0xff]  }
 0x3be   : > { %1907 = vmatpush1.bf16.msra.mxu0 %v3326_v3  ;;  %v3394_v3 = vld [vmem:[#allocation13 + $0x14] ss:$8 sps:$4 sm:$0xff]  }
 0x3bf   : > { %1908 = vmatprep.subr.bf16.mxu0 %v3331_v4  ;;  %v3392_v4 = vld [vmem:[#allocation13 + $0x10] ss:$8 sps:$4 sm:$0xff]  }
 0x3c2   : > { %1909 = vmatpush1.bf16.msra.mxu0 %v3329_v5  ;;  %v3397_v5 = vld [vmem:[#allocation13 + $0x24] ss:$8 sps:$4 sm:$0xff]  }
 0x3c3   : > { %1910 = vmatprep.subr.bf16.mxu0 %v3334_v6  ;;  %v3395_v6 = vld [vmem:[#allocation13 + $0x20] ss:$8 sps:$4 sm:$0xff]  }
 0x3c6   : > { %1911 = vmatpush1.bf16.msra.mxu0 %v3332_v1  ;;  %v3400_v1 = vld [vmem:[#allocation13 + $0x34] ss:$8 sps:$4 sm:$0xff]  }
 0x3c7   : > { %1912 = vmatprep.subr.bf16.mxu0 %v3337_v7  ;;  %v3398_v7 = vld [vmem:[#allocation13 + $0x30] ss:$8 sps:$4 sm:$0xff]  }
 0x3ca   : > { %1913 = vmatpush1.bf16.msra.mxu0 %v3335_v8  ;;  %v3403_v8 = vld [vmem:[#allocation13 + $0x44] ss:$8 sps:$4 sm:$0xff]  }
 0x3cb   : > { %1914 = vmatprep.subr.bf16.mxu0 %v3340_v2  ;;  %v3401_v2 = vld [vmem:[#allocation13 + $0x40] ss:$8 sps:$4 sm:$0xff]  }
 0x3ce   : > { %1915 = vmatpush1.bf16.msra.mxu0 %v3338_v9  ;;  %v3406_v9 = vld [vmem:[#allocation13 + $0x54] ss:$8 sps:$4 sm:$0xff]  }
 0x3cf   : > { %2398 = vmatprep.subr.bf16.mxu0 %v3391_v0 }
 0x464   : > { %v1369_v40 = vpop.f32.mrb[4].mxu0 }
 0x465   : > { %v1370_v42 = vadd.f32 %v1369_v40, %v1253_v38  ;;  %v1371_v44 = vpop.f32.mrb[5].mxu0 }
 0x466   : > { %v1372_v46 = vadd.f32 %v1371_v44, %v1254_v39  ;;  %v1373_v48 = vpop.f32.mrb[6].mxu0 }
 0x467   : > { %v1395_v49 = vadd.f32 %v1393_v41, %v1370_v42  ;;  %v1374_v50 = vpop.f32.mrb[7].mxu0 }
 0x468   : > { %v1396_v51 = vadd.f32 %v1394_v45, %v1372_v46 }
 0x469   : > { %v1409_v52 = vadd.f32 %v1402_v43, %v1395_v49 }
 0x46a   : > { %v1410_v53 = vadd.f32 %v1406_v47, %v1396_v51 }
 0x46b   : > { %v1413_v54 = vmul.f32 1.442695, %v1409_v52  ;;  %vm1411_vm15 = vcmp.gt.f32.partialorder %v1409_v52, 0.0 }
 0x46c   : > { %v1415_v55 = vmul.f32 1.442695, %v1410_v53  ;;  %vm1412_vm0 = vcmp.gt.f32.partialorder %v1410_v53, 0.0 }
 0x46d   : > { %3477 = vpow2.f32 %v1413_v54  ;;  %v3374_v54 = vld [vmem:[#allocation12 + $0xb0] ss:$8 sps:$4 sm:$0xff]  }
 0x46e   : > { %3479 = vpow2.f32 %v1415_v55  ;;  %v3379_v55 = vld [vmem:[#allocation12 + $0xc4] ss:$8 sps:$4 sm:$0xff]  }
 0x477   : > { %v3478_v56 = vpop.eup %3477 }
 0x478   : > { %v3480_v57 = vpop.eup %3479  ;;  %v2846_v58 = vadd.f32 -1.0, %v3478_v56  ;;  %v3377_v56 = vld [vmem:[#allocation12 + $0xc0] ss:$8 sps:$4 sm:$0xff]  }
 0x479   : > { %v2847_v59 = vadd.f32 -1.0, %v3480_v57  ;;  %v3382_v57 = vld [vmem:[#allocation12 + $0xd4] ss:$8 sps:$4 sm:$0xff]  }
 0x47a   : > { %v1419_v60 = vsel %vm1411_vm15, %v1409_v52, %v2846_v58  ;;  %v3380_v58 = vld [vmem:[#allocation12 + $0xd0] ss:$8 sps:$4 sm:$0xff]  }
 0x47b   : > { %v1420_v61 = vsel %vm1412_vm0, %v1410_v53, %v2847_v59  ;;  %v1421_v63 = vpack.c.bf16 %v1419_v60, %v1419_v60  ;;  %v3376_v53 = vld [vmem:[#allocation12 + $0xb4] ss:$8 sps:$4 sm:$0xff]   ;;  %v3385_v59 = vld [vmem:[#allocation12 + $0xe4] ss:$8 sps:$4 sm:$0xff]   ;;  %v3383_v60 = vld [vmem:[#allocation12 + $0xe0] ss:$8 sps:$4 sm:$0xff]  }
 0x47c   : > { %v1422_v62 = vpack.c.bf16 %v1420_v61, %v1420_v61  ;;  %v3388_v61 = vld [vmem:[#allocation12 + $0xf4] ss:$8 sps:$4 sm:$0xff]  }
 0x47e   : > { %1659 = vmatprep.mubr.bf16.mxu1 %v1422_v62  ;;  %v3386_v62 = vld [vmem:[#allocation12 + $0xf0] ss:$8 sps:$4 sm:$0xff]  }
 0x47f   : > { %1660 = vmatmul.mubr.bf16.vlgmr.msra.gmra.mrb[4].mxu1 %v1421_v63  ;;  %v3389_v63 = vld [vmem:[#allocation13] ss:$8 sps:$4 sm:$0xff]  }
 0x480   : > { %2142 = vmatpush1.bf16.msra.mxu1 %v3341_v10  ;;  %v3404_v10 = vld [vmem:[#allocation13 + $0x50] ss:$8 sps:$4 sm:$0xff]  }
 0x481   : > { %2143 = vmatprep.subr.bf16.mxu1 %v3346_v12  ;;  %v3407_v12 = vld [vmem:[#allocation13 + $0x60] ss:$8 sps:$4 sm:$0xff]  }
 0x484   : > { %2144 = vmatpush1.bf16.msra.mxu1 %v3344_v13  ;;  %v3412_v13 = vld [vmem:[#allocation13 + $0x74] ss:$8 sps:$4 sm:$0xff]  }
 0x485   : > { %2145 = vmatprep.subr.bf16.mxu1 %v3349_v14  ;;  %v3410_v14 = vld [vmem:[#allocation13 + $0x70] ss:$8 sps:$4 sm:$0xff]  }
 0x488   : > { %2146 = vmatpush1.bf16.msra.mxu1 %v3347_v15  ;;  %v3415_v15 = vld [vmem:[#allocation13 + $0x84] ss:$8 sps:$4 sm:$0xff]  }
 0x489   : > { %2147 = vmatprep.subr.bf16.mxu1 %v3352_v16  ;;  %v3413_v16 = vld [vmem:[#allocation13 + $0x80] ss:$8 sps:$4 sm:$0xff]  }
 0x48c   : > { %2148 = vmatpush1.bf16.msra.mxu1 %v3350_v17  ;;  %v3418_v17 = vld [vmem:[#allocation13 + $0x94] ss:$8 sps:$4 sm:$0xff]  }
 0x48d   : > { %2149 = vmatprep.subr.bf16.mxu1 %v3355_v18  ;;  %v3416_v18 = vld [vmem:[#allocation13 + $0x90] ss:$8 sps:$4 sm:$0xff]  }
 0x490   : > { %2150 = vmatpush1.bf16.msra.mxu1 %v3353_v19  ;;  %v3421_v19 = vld [vmem:[#allocation13 + $0xa4] ss:$8 sps:$4 sm:$0xff]  }
 0x491   : > { %2151 = vmatprep.subr.bf16.mxu1 %v3358_v20  ;;  %v3419_v20 = vld [vmem:[#allocation13 + $0xa0] ss:$8 sps:$4 sm:$0xff]  }
 0x494   : > { %2152 = vmatpush1.bf16.msra.mxu1 %v3356_v21  ;;  %v1712_v21 = vld [vmem:[%s4345_s15] sm:$0x3] }
 0x495   : > { %2153 = vmatprep.subr.bf16.mxu1 %v3361_v22  ;;  %v1717_v22 = vrot.slane %v1712_v21, %v4236_v28 }
 0x498   : > { %2154 = vmatpush1.bf16.msra.mxu1 %v3359_v23  ;;  %v1721_v23 = vrot.slane %v1712_v21, %v4238_v29  ;;  %v3451_v21 = vld [vmem:[%s4350_s20 + $0x78] sm:$0xff]  }
 0x499   : > { %2155 = vmatprep.subr.bf16.mxu1 %v3364_v24 }
 0x49c   : > { %2156 = vmatpush1.bf16.msra.mxu1 %v3362_v25 }
 0x49d   : > { %2157 = vmatprep.subr.bf16.mxu1 %v3367_v26 }
 0x4a0   : > { %2158 = vmatpush1.bf16.msra.mxu1 %v3365_v27 }
 0x4a1   : > { %2159 = vmatprep.subr.bf16.mxu1 %v3370_v30 }
 0x4a4   : > { %2160 = vmatpush1.bf16.msra.mxu1 %v3368_v31 }
 0x4a5   : > { %2161 = vmatprep.subr.bf16.mxu1 %v3373_v32 }
 0x4a8   : > { %2162 = vmatpush1.bf16.msra.mxu1 %v3371_v33 }
 0x4a9   : > { %2163 = vmatprep.subr.bf16.mxu1 %v3376_v53  ;;  %v3438_v53 = vld [vmem:[%s4350_s20] sm:$0xff]  }
 0x4ac   : > { %2164 = vmatpush1.bf16.msra.mxu1 %v3374_v54  ;;  %v3439_v54 = vld [vmem:[%s4350_s20 + $0x48] sm:$0xff]  }
 0x4ad   : > { %2165 = vmatprep.subr.bf16.mxu1 %v3379_v55  ;;  %v3440_v55 = vld [vmem:[%s4350_s20 + $0x8] sm:$0xff]  }
 0x4b0   : > { %2166 = vmatpush1.bf16.msra.mxu1 %v3377_v56  ;;  %v3441_v56 = vld [vmem:[%s4350_s20 + $0x50] sm:$0xff]  }
 0x4b1   : > { %2167 = vmatprep.subr.bf16.mxu1 %v3382_v57  ;;  %v1969_v57 = vld [vmem:[%s4347_s17] sm:$0x3] }
 0x4b4   : > { %2168 = vmatpush1.bf16.msra.mxu1 %v3380_v58  ;;  %v1974_v58 = vrot.slane %v1969_v57, %v4236_v28 }
 0x4b5   : > { %2169 = vmatprep.subr.bf16.mxu1 %v3385_v59  ;;  %v1978_v59 = vrot.slane %v1969_v57, %v4238_v29 }
 0x4b8   : > { %2170 = vmatpush1.bf16.msra.mxu1 %v3383_v60 }
 0x4b9   : > { %2171 = vmatprep.subr.bf16.mxu1 %v3388_v61 }
 0x4bc   : > { %2172 = vmatpush1.bf16.msra.mxu1 %v3386_v62 }
 0x552   : > { %v1661_v37 = vpop.f32.mrb[4].mxu1 }
 0x553   : > { %v1662_v38 = vadd.f32 %v1661_v37, %v1460_v35  ;;  %v1663_v39 = vpop.f32.mrb[5].mxu1 }
 0x554   : > { %v1664_v40 = vadd.f32 %v1663_v39, %v1464_v36  ;;  %v1665_v41 = vpop.f32.mrb[6].mxu1 }
 0x555   : > { %v1670_v42 = vmul.f32 1.442695, %v1662_v38  ;;  %v1666_v43 = vpop.f32.mrb[7].mxu1  ;;  %vm1668_vm1 = vcmp.gt.f32.partialorder %v1662_v38, 0.0 }
 0x556   : > { %v1672_v44 = vmul.f32 1.442695, %v1664_v40  ;;  %vm1669_vm2 = vcmp.gt.f32.partialorder %v1664_v40, 0.0  ;;  %v3422_v43 = vld [vmem:[#allocation13 + $0xb0] ss:$8 sps:$4 sm:$0xff]  }
 0x557   : > { %3481 = vpow2.f32 %v1670_v42  ;;  %v3424_v42 = vld [vmem:[#allocation13 + $0xb4] ss:$8 sps:$4 sm:$0xff]  }
 0x558   : > { %3483 = vpow2.f32 %v1672_v44  ;;  %v3427_v44 = vld [vmem:[#allocation13 + $0xc4] ss:$8 sps:$4 sm:$0xff]  }
 0x561   : > { %v3482_v45 = vpop.eup %3481 }
 0x562   : > { %v3484_v46 = vpop.eup %3483  ;;  %v2880_v47 = vadd.f32 -1.0, %v3482_v45  ;;  %v3425_v45 = vld [vmem:[#allocation13 + $0xc0] ss:$8 sps:$4 sm:$0xff]  }
 0x563   : > { %v2881_v48 = vadd.f32 -1.0, %v3484_v46  ;;  %v3430_v46 = vld [vmem:[#allocation13 + $0xd4] ss:$8 sps:$4 sm:$0xff]  }
 0x564   : > { %v1676_v49 = vsel %vm1668_vm1, %v1662_v38, %v2880_v47  ;;  %v3428_v47 = vld [vmem:[#allocation13 + $0xd0] ss:$8 sps:$4 sm:$0xff]  }
 0x565   : > { %v1677_v50 = vsel %vm1669_vm2, %v1664_v40, %v2881_v48  ;;  %v1678_v52 = vpack.c.bf16 %v1676_v49, %v1676_v49  ;;  %v3433_v48 = vld [vmem:[#allocation13 + $0xe4] ss:$8 sps:$4 sm:$0xff]   ;;  %v3431_v49 = vld [vmem:[#allocation13 + $0xe0] ss:$8 sps:$4 sm:$0xff]  }
 0x566   : > { %v1679_v51 = vpack.c.bf16 %v1677_v50, %v1677_v50  ;;  %v3436_v50 = vld [vmem:[#allocation13 + $0xf4] ss:$8 sps:$4 sm:$0xff]  }
 0x568   : > { %1916 = vmatprep.mubr.bf16.mxu0 %v1679_v51  ;;  %v3434_v51 = vld [vmem:[#allocation13 + $0xf0] ss:$8 sps:$4 sm:$0xff]  }
 0x569   : > { %1917 = vmatmul.mubr.bf16.vlgmr.msra.gmra.mrb[8].mxu0 %v1678_v52  ;;  %v3437_v52 = vld [vmem:[%s4350_s20 + $0x40] sm:$0xff]  }
 0x56a   : > { %2399 = vmatpush1.bf16.msra.mxu0 %v3389_v63  ;;  %3023 = vmatprep.subr.bf16.mxu1 %v3437_v52 }
 0x56b   : > { %2400 = vmatprep.subr.bf16.mxu0 %v3394_v3 }
 0x56e   : > { %2401 = vmatpush1.bf16.msra.mxu0 %v3392_v4 }
 0x56f   : > { %2402 = vmatprep.subr.bf16.mxu0 %v3397_v5 }
 0x572   : > { %2403 = vmatpush1.bf16.msra.mxu0 %v3395_v6 }
 0x573   : > { %2404 = vmatprep.subr.bf16.mxu0 %v3400_v1 }
 0x576   : > { %2405 = vmatpush1.bf16.msra.mxu0 %v3398_v7 }
 0x577   : > { %2406 = vmatprep.subr.bf16.mxu0 %v3403_v8 }
 0x57a   : > { %2407 = vmatpush1.bf16.msra.mxu0 %v3401_v2 }
 0x57b   : > { %2408 = vmatprep.subr.bf16.mxu0 %v3406_v9 }
 0x57e   : > { %2409 = vmatpush1.bf16.msra.mxu0 %v3404_v10 }
 0x57f   : > { %2410 = vmatprep.subr.bf16.mxu0 %v3409_v11 }
 0x582   : > { %2411 = vmatpush1.bf16.msra.mxu0 %v3407_v12  ;;  %v3442_v12 = vld [vmem:[%s4350_s20 + $0x10] sm:$0xff]  }
 0x583   : > { %2412 = vmatprep.subr.bf16.mxu0 %v3412_v13  ;;  %v3443_v13 = vld [vmem:[%s4350_s20 + $0x58] sm:$0xff]  }
 0x586   : > { %2413 = vmatpush1.bf16.msra.mxu0 %v3410_v14  ;;  %v3444_v14 = vld [vmem:[%s4350_s20 + $0x18] sm:$0xff]  }
 0x587   : > { %2414 = vmatprep.subr.bf16.mxu0 %v3415_v15  ;;  %v3445_v15 = vld [vmem:[%s4350_s20 + $0x60] sm:$0xff]  }
 0x58a   : > { %2415 = vmatpush1.bf16.msra.mxu0 %v3413_v16  ;;  %v3446_v16 = vld [vmem:[%s4350_s20 + $0x20] sm:$0xff]  }
 0x58b   : > { %2416 = vmatprep.subr.bf16.mxu0 %v3418_v17  ;;  %v3447_v17 = vld [vmem:[%s4350_s20 + $0x68] sm:$0xff]  }
 0x58e   : > { %2417 = vmatpush1.bf16.msra.mxu0 %v3416_v18  ;;  %v3448_v18 = vld [vmem:[%s4350_s20 + $0x28] sm:$0xff]  }
 0x58f   : > { %2418 = vmatprep.subr.bf16.mxu0 %v3421_v19  ;;  %v3449_v19 = vld [vmem:[%s4350_s20 + $0x70] sm:$0xff]  }
 0x592   : > { %2419 = vmatpush1.bf16.msra.mxu0 %v3419_v20  ;;  %v3450_v20 = vld [vmem:[%s4350_s20 + $0x30] sm:$0xff]  }
 0x593   : > { %2420 = vmatprep.subr.bf16.mxu0 %v3424_v42 }
 0x596   : > { %2421 = vmatpush1.bf16.msra.mxu0 %v3422_v43  ;;  %v2984_v43 = vld [vmem:[%s4405_s2] ss:$0 sm:$0xff] }
 0x597   : > { %2422 = vmatprep.subr.bf16.mxu0 %v3427_v44 }
 0x59a   : > { %2423 = vmatpush1.bf16.msra.mxu0 %v3425_v45 }
 0x59b   : > { %2424 = vmatprep.subr.bf16.mxu0 %v3430_v46 }
 0x59e   : > { %2425 = vmatpush1.bf16.msra.mxu0 %v3428_v47 }
 0x59f   : > { %2426 = vmatprep.subr.bf16.mxu0 %v3433_v48 }
 0x5a2   : > { %2427 = vmatpush1.bf16.msra.mxu0 %v3431_v49 }
 0x5a3   : > { %2428 = vmatprep.subr.bf16.mxu0 %v3436_v50 }
 0x5a6   : > { %2429 = vmatpush1.bf16.msra.mxu0 %v3434_v51 }
 0x63c   : > { %v1918_v24 = vpop.f32.mrb[8].mxu0 }
 0x63d   : > { %v1919_v25 = vadd.f32 %v1918_v24, %v1717_v22  ;;  %v1920_v26 = vpop.f32.mrb[9].mxu0  ;;  %v3452_v22 = vld [vmem:[%s4350_s20 + $0x38] sm:$0xff]  }
 0x63e   : > { %v1921_v27 = vadd.f32 %v1920_v26, %v1721_v23  ;;  %v1922_v30 = vpop.f32.mrb[10].mxu0  ;;  %v2226_v23 = vld [vmem:[%s4404_s6] sm:$0x3] }
 0x63f   : > { %v1927_v31 = vmul.f32 1.442695, %v1919_v25  ;;  %v1923_v32 = vpop.f32.mrb[11].mxu0  ;;  %vm1925_vm3 = vcmp.gt.f32.partialorder %v1919_v25, 0.0  ;;  %v2231_v24 = vrot.slane %v2226_v23, %v4236_v28 }
 0x640   : > { %v1929_v33 = vmul.f32 1.442695, %v1921_v27  ;;  %vm1926_vm4 = vcmp.gt.f32.partialorder %v1921_v27, 0.0 }
 0x641   : > { %3485 = vpow2.f32 %v1927_v31 }
 0x642   : > { %3487 = vpow2.f32 %v1929_v33 }
 0x64b   : > { %v3486_v34 = vpop.eup %3485 }
 0x64c   : > { %v3488_v35 = vpop.eup %3487  ;;  %v2914_v36 = vadd.f32 -1.0, %v3486_v34 }
 0x64d   : > { %v2915_v37 = vadd.f32 -1.0, %v3488_v35 }
 0x64e   : > { %v1933_v38 = vsel %vm1925_vm3, %v1919_v25, %v2914_v36  ;;  %v2235_v25 = vrot.slane %v2226_v23, %v4238_v29 }
 0x64f   : > { %v1934_v39 = vsel %vm1926_vm4, %v1921_v27, %v2915_v37  ;;  %v1935_v41 = vpack.c.bf16 %v1933_v38, %v1933_v38 }
 0x650   : > { %v1936_v40 = vpack.c.bf16 %v1934_v39, %v1934_v39 }
 0x652   : > { %2173 = vmatprep.mubr.bf16.mxu1 %v1936_v40 }
 0x653   : > { %2174 = vmatmul.mubr.bf16.vlgmr.msra.gmra.mrb[8].mxu1 %v1935_v41 }
 0x654   : > { %3024 = vmatpush3.bf16.msra.mxu1 %v3438_v53 }
 0x655   : > { %3025 = vmatprep.subr.bf16.mxu1 %v3439_v54 }
 0x658   : > { %3026 = vmatpush3.bf16.msra.mxu1 %v3440_v55 }
 0x659   : > { %3027 = vmatprep.subr.bf16.mxu1 %v3441_v56 }
 0x65c   : > { %3028 = vmatpush3.bf16.msra.mxu1 %v3442_v12 }
 0x65d   : > { %3029 = vmatprep.subr.bf16.mxu1 %v3443_v13 }
 0x660   : > { %3030 = vmatpush3.bf16.msra.mxu1 %v3444_v14 }
 0x661   : > { %3031 = vmatprep.subr.bf16.mxu1 %v3445_v15 }
 0x664   : > { %3032 = vmatpush3.bf16.msra.mxu1 %v3446_v16 }
 0x665   : > { %3033 = vmatprep.subr.bf16.mxu1 %v3447_v17 }
 0x668   : > { %3034 = vmatpush3.bf16.msra.mxu1 %v3448_v18 }
 0x669   : > { %3035 = vmatprep.subr.bf16.mxu1 %v3449_v19 }
 0x66c   : > { %3036 = vmatpush3.bf16.msra.mxu1 %v3450_v20 }
 0x66d   : > { %3037 = vmatprep.subr.bf16.mxu1 %v3451_v21 }
 0x670   : > { %3038 = vmatpush3.bf16.msra.mxu1 %v3452_v22 }
 0x726   : > { %v2175_v60 = vpop.f32.mrb[8].mxu1 }
 0x727   : > { %v2176_v61 = vadd.f32 %v2175_v60, %v1974_v58  ;;  %v2177_v62 = vpop.f32.mrb[9].mxu1 }
 0x728   : > { %v2178_v63 = vadd.f32 %v2177_v62, %v1978_v59  ;;  %v2179_v0 = vpop.f32.mrb[10].mxu1 }
 0x729   : > { %v2184_v3 = vmul.f32 1.442695, %v2176_v61  ;;  %v2180_v4 = vpop.f32.mrb[11].mxu1  ;;  %vm2182_vm5 = vcmp.gt.f32.partialorder %v2176_v61, 0.0 }
 0x72a   : > { %v2186_v5 = vmul.f32 1.442695, %v2178_v63  ;;  %vm2183_vm6 = vcmp.gt.f32.partialorder %v2178_v63, 0.0 }
 0x72b   : > { %3489 = vpow2.f32 %v2184_v3 }
 0x72c   : > { %3491 = vpow2.f32 %v2186_v5 }
 0x735   : > { %v3490_v6 = vpop.eup %3489 }
 0x736   : > { %v3492_v1 = vpop.eup %3491  ;;  %v2948_v7 = vadd.f32 -1.0, %v3490_v6 }
 0x737   : > { %v2949_v8 = vadd.f32 -1.0, %v3492_v1 }
 0x738   : > { %v2190_v2 = vsel %vm2182_vm5, %v2176_v61, %v2948_v7 }
 0x739   : > { %v2191_v9 = vsel %vm2183_vm6, %v2178_v63, %v2949_v8  ;;  %v2192_v11 = vpack.c.bf16 %v2190_v2, %v2190_v2 }
 0x73a   : > { %v2193_v10 = vpack.c.bf16 %v2191_v9, %v2191_v9 }
 0x73c   : > { %2430 = vmatprep.mubr.bf16.mxu0 %v2193_v10 }
 0x73d   : > { %2431 = vmatmul.mubr.bf16.vlgmr.msra.gmra.mrb[12].mxu0 %v2192_v11 }
 0x810   : > { %v2432_v26 = vpop.f32.mrb[12].mxu0 }
 0x811   : > { %v2433_v27 = vadd.f32 %v2432_v26, %v2231_v24  ;;  %v2434_v30 = vpop.f32.mrb[13].mxu0 }
 0x812   : > { %v2435_v31 = vadd.f32 %v2434_v30, %v2235_v25  ;;  %v2436_v32 = vpop.f32.mrb[14].mxu0 }
 0x813   : > { %v2441_v33 = vmul.f32 1.442695, %v2433_v27  ;;  %v2437_v34 = vpop.f32.mrb[15].mxu0  ;;  %vm2439_vm7 = vcmp.gt.f32.partialorder %v2433_v27, 0.0 }
 0x814   : > { %v2443_v35 = vmul.f32 1.442695, %v2435_v31  ;;  %vm2440_vm8 = vcmp.gt.f32.partialorder %v2435_v31, 0.0 }
 0x815   : > { %3493 = vpow2.f32 %v2441_v33 }
 0x816   : > { %3495 = vpow2.f32 %v2443_v35 }
 0x81f   : > { %v3494_v36 = vpop.eup %3493 }
 0x820   : > { %v3496_v37 = vpop.eup %3495  ;;  %v2982_v38 = vadd.f32 -1.0, %v3494_v36 }
 0x821   : > { %v2983_v39 = vadd.f32 -1.0, %v3496_v37 }
 0x822   : > { %v2447_v40 = vsel %vm2439_vm7, %v2433_v27, %v2982_v38 }
 0x823   : > { %v2448_v28 = vsel %vm2440_vm8, %v2435_v31, %v2983_v39  ;;  %v2449_v41 = vpack.c.bf16 %v2447_v40, %v2447_v40 }
 0x824   : > { %v2450_v29 = vpack.c.bf16 %v2448_v28, %v2448_v28 }
 0x826   : > { %2618 = vmatprep.mubr.bf16.mxu1 %v2450_v29 }
 0x827   : > { %2619 = vmatmul.mubr.bf16.vlgmr.msra.gmra.mrb[12].mxu1 %v2449_v41 }
 0x8fa   : > { %v3039_v42 = vpop.f32.mrb[12].mxu1 }
 0x8fb   : > { %v3040_v44 = vpop.f32.mrb[13].mxu1 }
 0x8fc   : > { %v3041_v45 = vadd.f32 %v3040_v44, %v3039_v42  ;;  %v3042_v46 = vpop.f32.mrb[14].mxu1 }
 0x8fd   : > { %v3043_v47 = vpop.f32.mrb[15].mxu1 }
 0x8fe   : > { %v2621_v48 = vadd.f32 %v3041_v45, %v2984_v43 }
 0x900   : > { %2627 = vst.msk [vmem:[%s806_s5] sm:$0xff] %vm2626_vm9, %v2621_v48 }
 0x901 PF: > { %s4407_s3 = sld [smem:[#allocation20_spill]] }
 0x907   : > { %s37_s3 = sadd.s32 1, %s4407_s3  }
 0x908   : > { %p34_p11 = scmp.ge.s32.totalorder %s37_s3, 4  }
 0x90a   :  { %36 = sbr.rel (!%p34_p11) target bundleno = 18 (0x12), region = 174 }
 0x911   :  { %2647 = vsyncpa [#allocation3], 1 }
 0x912   :  { %2649 = vsyncpa [#allocation3 + $0x1], 1 }
 0x913   :  { %2650 = vsyncpa [#allocation5], 1 }
 0x914   :  { %2651 = vsyncpa [#allocation8], 1 }
 0x915   :  { %2652 = vsyncpa [#allocation11], 1 }
 0x916   :  { %2653 = vsyncpa [#allocation14], 1 }

</bundles_post_ra>
